<compile_context>
chip_gen: v7x
topology: tpu7x:2x2x1
jax: 0.10.0
libtpu: 0.0.40
codegen_flags: <defaults>
</compile_context>

<pallas_src>
from typing import NamedTuple

import jax
import jax.numpy as jnp
from jax.experimental import pallas as pl
from jax.experimental.pallas import tpu as pltpu


LANE = 128          # TPU lane width: pad all feature dims to a multiple of this.
SUBLANE_BF16 = 16   # bf16 sublane packing: pad the node dim to a multiple of this.


def _round_up(x, m):
    return (x + m - 1) // m * m


def _pad_to(a, shape):
    return jnp.pad(a, [(0, t - s) for s, t in zip(a.shape, shape)])


# ------------------------------- kernel ---------------------------------------------


def slp_gcn_kernel(adj_ref, x_ref,
                   wfc_ref, bfc_ref,
                   w1_ref, b1_ref,
                   w2_ref, b2_ref,
                   w3_ref, b3_ref,
                   w4_ref, b4_ref,
                   o_ref):
    """One grid step = a stack of graphs (block-diagonal adj).  All operands bf16;
    accumulation, bias add and ReLU in f32; activations re-cast to bf16 per layer."""

    def gcn(h_bf16, w_ref, b_ref):
        # DGL GraphConv (norm='both'):  A_hat @ (h @ W) + b
        hw = jnp.dot(h_bf16, w_ref[...], preferred_element_type=jnp.float32)
        # Re-read adj from VMEM each layer (cheap vld) instead of pinning 8+ vregs.
        agg = jnp.dot(adj_ref[...], hw.astype(jnp.bfloat16),
                      preferred_element_type=jnp.float32)
        return agg + b_ref[...]

    # h1 = relu(fc(x))
    h = jnp.dot(x_ref[...], wfc_ref[...],
                preferred_element_type=jnp.float32) + bfc_ref[...]
    h = jnp.maximum(h, 0.0).astype(jnp.bfloat16)
    # h2..h4 = relu(gcn_i(h))  -- bf16 activations between layers
    h = jnp.maximum(gcn(h, w1_ref, b1_ref), 0.0).astype(jnp.bfloat16)
    h = jnp.maximum(gcn(h, w2_ref, b2_ref), 0.0).astype(jnp.bfloat16)
    h = jnp.maximum(gcn(h, w3_ref, b3_ref), 0.0).astype(jnp.bfloat16)
    # h5 = gcn_4(h)  (no relu) -- single lane-dense store
    o_ref[...] = gcn(h, w4_ref, b4_ref).astype(o_ref.dtype)


# ------------------------------- wrapper ---------------------------------------------


class PreparedParams(NamedTuple):
    wfc: jax.Array
    bfc: jax.Array
    w1: jax.Array
    b1: jax.Array
    w2: jax.Array
    b2: jax.Array
    w3: jax.Array
    b3: jax.Array
    w4: jax.Array
    b4: jax.Array
    in_feats: int
    h_feats: int
    out_feats: int
    Fip: int
    Hp: int
    Fop: int


def prepare_params(params):
    """Pad + cast the weights/biases ONCE (call at init time, reuse every forward)."""
    (wfc, bfc, w1, b1, w2, b2, w3, b3, w4, b4) = params
    in_feats, h_feats = wfc.shape
    out_feats = w4.shape[1]
    Fip = _round_up(in_feats, LANE)
    Hp = _round_up(h_feats, LANE)
    Fop = _round_up(out_feats, LANE)
    bf16, f32 = jnp.bfloat16, jnp.float32

    def pw(w, shape):
        return _pad_to(w.astype(f32), shape).astype(bf16)

    def pb(b, shape):
        return _pad_to(b.reshape(1, -1).astype(f32), shape)

    return PreparedParams(
        pw(wfc, (Fip, Hp)), pb(bfc, (1, Hp)),
        pw(w1, (Hp, Hp)), pb(b1, (1, Hp)),
        pw(w2, (Hp, Hp)), pb(b2, (1, Hp)),
        pw(w3, (Hp, Hp)), pb(b3, (1, Hp)),
        pw(w4, (Hp, Fop)), pb(b4, (1, Fop)),
        in_feats, h_feats, out_feats, Fip, Hp, Fop)


def _default_num_steps(batch):
    """v7x: 2 parallel steps (one per TensorCore).  v5e/v6e: 1 big step (single TC; a
    bigger M amortizes per-step overhead and fills v6e's 256-wide MXU)."""
    if batch >= 2 and batch % 2 == 0:
        try:
            kind = jax.devices()[0].device_kind.lower()
        except Exception:
            kind = ""
        if "v7" in kind:
            return 2
    return 1


def slp_gcn_forward(adj_hat, x, prep: PreparedParams, *, num_steps=None):
    """adj_hat: (B,N,N) or (N,N) normalized adjacency; x: (B,N,Fin) or (N,Fin)."""
    single = adj_hat.ndim == 2
    if single:
        adj_hat, x = adj_hat[None], x[None]

    B, N, Fin = x.shape
    assert Fin == prep.in_feats
    Np = _round_up(N, SUBLANE_BF16)

    if num_steps is None:
        num_steps = _default_num_steps(B)
    assert B % num_steps == 0, "num_steps must divide the batch"
    gper = B // num_steps          # graphs stacked per grid step
    M = gper * Np                  # stacked node rows per step
    Fip, Hp, Fop = prep.Fip, prep.Hp, prep.Fop
    bf16, f32 = jnp.bfloat16, jnp.float32

    # Per-call (data-dependent) prep: pad nodes to Np, build per-step block-diagonal
    # adjacency, pad/cast x.  Weights were prepared once in prepare_params().
    adj_p = _pad_to(adj_hat.astype(f32), (B, Np, Np))
    adjb = adj_p.reshape(num_steps, gper, Np, Np)
    eye = jnp.eye(gper, dtype=f32)
    adj_bd = jnp.einsum("spij,pq->spiqj", adjb, eye).reshape(num_steps, M, M).astype(bf16)

    x_p = _pad_to(x.astype(f32), (B, Np, Fip)).astype(bf16).reshape(B * Np, Fip)

    in_specs = [
        pl.BlockSpec((None, M, M), lambda s: (s, 0, 0)),   # block-diag adj (per step)
        pl.BlockSpec((M, Fip),     lambda s: (s, 0)),      # stacked x rows for step s
        pl.BlockSpec((Fip, Hp),    lambda s: (0, 0)),      # wfc (VMEM-resident)
        pl.BlockSpec((1, Hp),      lambda s: (0, 0)),      # bfc
        pl.BlockSpec((Hp, Hp),     lambda s: (0, 0)),      # w1
        pl.BlockSpec((1, Hp),      lambda s: (0, 0)),      # b1
        pl.BlockSpec((Hp, Hp),     lambda s: (0, 0)),      # w2
        pl.BlockSpec((1, Hp),      lambda s: (0, 0)),      # b2
        pl.BlockSpec((Hp, Hp),     lambda s: (0, 0)),      # w3
        pl.BlockSpec((1, Hp),      lambda s: (0, 0)),      # b3
        pl.BlockSpec((Hp, Fop),    lambda s: (0, 0)),      # w4
        pl.BlockSpec((1, Fop),     lambda s: (0, 0)),      # b4
    ]

    out = pl.pallas_call(
        slp_gcn_kernel,
        out_shape=jax.ShapeDtypeStruct((B * Np, Fop), f32),
        grid=(num_steps,),
        in_specs=in_specs,
        out_specs=pl.BlockSpec((M, Fop), lambda s: (s, 0)),
        compiler_params=pltpu.CompilerParams(
            dimension_semantics=("parallel",)),   # steps independent -> megacore split
    )(adj_bd, x_p,
      prep.wfc, prep.bfc, prep.w1, prep.b1, prep.w2, prep.b2,
      prep.w3, prep.b3, prep.w4, prep.b4)

    out = out.reshape(B, Np, Fop)[:, :N, :prep.out_feats]
    return out[0] if single else out


# ----------------------------- references & test ------------------------------------


def reference_forward_f32(adj_hat, x, params):
    (wfc, bfc, w1, b1, w2, b2, w3, b3, w4, b4) = params
    h = jax.nn.relu(x @ wfc + bfc)
    h = jax.nn.relu(adj_hat @ (h @ w1) + b1)
    h = jax.nn.relu(adj_hat @ (h @ w2) + b2)
    h = jax.nn.relu(adj_hat @ (h @ w3) + b3)
    return adj_hat @ (h @ w4) + b4


def reference_forward_matched(adj_hat, x, params):
    # Mirrors the kernel's bf16-operand / f32-accumulate / bf16-activation arithmetic.
    (wfc, bfc, w1, b1, w2, b2, w3, b3, w4, b4) = params
    bf = jnp.bfloat16

    def mm(a, b):
        return jnp.dot(a.astype(bf), b.astype(bf), preferred_element_type=jnp.float32)

    def gcn(h_bf, w, b):
        return mm(adj_hat, mm(h_bf, w)) + b

    h = jnp.maximum(mm(x, wfc) + bfc, 0.0).astype(bf)
    h = jnp.maximum(gcn(h, w1, b1), 0.0).astype(bf)
    h = jnp.maximum(gcn(h, w2, b2), 0.0).astype(bf)
    h = jnp.maximum(gcn(h, w3, b3), 0.0).astype(bf)
    return gcn(h, w4, b4)


def make_params(key, in_feats, h_feats, out_feats):
    ks = jax.random.split(key, 10)

    def u(k, shape, fan_in):
        bound = 1.0 / jnp.sqrt(fan_in)
        return jax.random.uniform(k, shape, jnp.float32, -bound, bound)

    # fc weight pre-transposed to [in_feats, h_feats]; biases kept 2D [1, F].
    wfc = u(ks[0], (in_feats, h_feats), in_feats)
    bfc = u(ks[1], (1, h_feats), in_feats)
    w1 = u(ks[2], (h_feats, h_feats), h_feats); b1 = u(ks[3], (1, h_feats), h_feats)
    w2 = u(ks[4], (h_feats, h_feats), h_feats); b2 = u(ks[5], (1, h_feats), h_feats)
    w3 = u(ks[6], (h_feats, h_feats), h_feats); b3 = u(ks[7], (1, h_feats), h_feats)
    w4 = u(ks[8], (h_feats, out_feats), h_feats); b4 = u(ks[9], (1, out_feats), h_feats)
    return (wfc, bfc, w1, b1, w2, b2, w3, b3, w4, b4)


def make_normalized_adj(key, n, p=0.2):
    # Random undirected graph + self loops; A_hat = D^{-1/2}(A+I)D^{-1/2}.
    a = (jax.random.uniform(key, (n, n)) < p).astype(jnp.float32)
    a = jnp.maximum(a, a.T)
    a = jnp.maximum(a, jnp.eye(n, dtype=jnp.float32))
    deg = a.sum(axis=1)
    d_inv_sqrt = 1.0 / jnp.sqrt(deg)
    return a * d_inv_sqrt[:, None] * d_inv_sqrt[None, :]


if __name__ == "__main__":
    key = jax.random.PRNGKey(0)
    batch, n_nodes, in_feats, h_feats, out_feats = 4, 64, 16, 32, 8

    k_adj, k_x, k_p = jax.random.split(key, 3)
    adj_hat = jax.vmap(lambda k: make_normalized_adj(k, n_nodes))(
        jax.random.split(k_adj, batch))
    x = jax.random.normal(k_x, (batch, n_nodes, in_feats), jnp.float32)
    params = make_params(k_p, in_feats, h_feats, out_feats)

    # Hoisted one-time weight padding/casting; prep is closed over (not re-done per call).
    prep = prepare_params(params)
    fwd = jax.jit(lambda a, xx: slp_gcn_forward(a, xx, prep))

    out = jax.block_until_ready(fwd(adj_hat, x))
    assert out.shape == (batch, n_nodes, out_feats)

    ref_matched = jax.vmap(lambda a, xx: reference_forward_matched(a, xx, params))(adj_hat, x)
    ref_f32 = jax.vmap(lambda a, xx: reference_forward_f32(a, xx, params))(adj_hat, x)

    # Exact-math check (same bf16-operand / f32-accumulate arithmetic as the kernel).
    assert jnp.allclose(out, ref_matched, atol=1e-3, rtol=1e-3), \
        f"matched-precision mismatch: {float(jnp.max(jnp.abs(out - ref_matched)))}"
    # Semantic check vs. full-f32 reference (loose tolerance for bf16 operands).
    assert jnp.allclose(out, ref_f32, atol=1e-1, rtol=1e-1), \
        f"f32-reference mismatch: {float(jnp.max(jnp.abs(out - ref_f32)))}"

    print("KERNEL_OK")
</pallas_src>

<mosaic_0001>
module attributes {stable_mosaic.version = 11 : i64} {
  func.func @slp_gcn_kernel(%arg0: i32, %arg1: memref<1x256x256xbf16, #tpu.memory_space<vmem>>, %arg2: memref<256x128xbf16, #tpu.memory_space<vmem>>, %arg3: memref<128x128xbf16, #tpu.memory_space<vmem>>, %arg4: memref<1x128xf32, #tpu.memory_space<vmem>>, %arg5: memref<128x128xbf16, #tpu.memory_space<vmem>>, %arg6: memref<1x128xf32, #tpu.memory_space<vmem>>, %arg7: memref<128x128xbf16, #tpu.memory_space<vmem>>, %arg8: memref<1x128xf32, #tpu.memory_space<vmem>>, %arg9: memref<128x128xbf16, #tpu.memory_space<vmem>>, %arg10: memref<1x128xf32, #tpu.memory_space<vmem>>, %arg11: memref<128x128xbf16, #tpu.memory_space<vmem>>, %arg12: memref<1x128xf32, #tpu.memory_space<vmem>>, %arg13: memref<256x128xf32, #tpu.memory_space<vmem>>) attributes {dimension_semantics = [#tpu.dimension_semantics<parallel>], iteration_bounds = array<i64: 1>, scalar_prefetch = 0 : i64, scratch_operands = 0 : i64, tpu.core_type = #tpu.core_type<tc>, window_params = [{transform_indices = @transform_0, window_bounds = array<i64: 1, 256, 256>}, {transform_indices = @transform_1, window_bounds = array<i64: 256, 128>}, {pipeline_mode = #tpu.pipeline_mode<synchronous>, transform_indices = @transform_2, window_bounds = array<i64: 128, 128>}, {pipeline_mode = #tpu.pipeline_mode<synchronous>, transform_indices = @transform_3, window_bounds = array<i64: 1, 128>}, {pipeline_mode = #tpu.pipeline_mode<synchronous>, transform_indices = @transform_4, window_bounds = array<i64: 128, 128>}, {pipeline_mode = #tpu.pipeline_mode<synchronous>, transform_indices = @transform_5, window_bounds = array<i64: 1, 128>}, {pipeline_mode = #tpu.pipeline_mode<synchronous>, transform_indices = @transform_6, window_bounds = array<i64: 128, 128>}, {pipeline_mode = #tpu.pipeline_mode<synchronous>, transform_indices = @transform_7, window_bounds = array<i64: 1, 128>}, {pipeline_mode = #tpu.pipeline_mode<synchronous>, transform_indices = @transform_8, window_bounds = array<i64: 128, 128>}, {pipeline_mode = #tpu.pipeline_mode<synchronous>, transform_indices = @transform_9, window_bounds = array<i64: 1, 128>}, {pipeline_mode = #tpu.pipeline_mode<synchronous>, transform_indices = @transform_10, window_bounds = array<i64: 128, 128>}, {pipeline_mode = #tpu.pipeline_mode<synchronous>, transform_indices = @transform_11, window_bounds = array<i64: 1, 128>}, {transform_indices = @transform_12, window_bounds = array<i64: 256, 128>}]} {
    %c0 = arith.constant 0 : index
    %c0_0 = arith.constant 0 : index
    %0 = vector.load %arg2[%c0, %c0_0] : memref<256x128xbf16, #tpu.memory_space<vmem>>, vector<256x128xbf16>
    %c0_1 = arith.constant 0 : index
    %c0_2 = arith.constant 0 : index
    %1 = vector.load %arg3[%c0_1, %c0_2] : memref<128x128xbf16, #tpu.memory_space<vmem>>, vector<128x128xbf16>
    %cst = arith.constant dense<0.000000e+00> : vector<256x128xf32>
    %2 = tpu.matmul %0, %1, %cst {dimension_numbers = #tpu.dot_dimension_numbers<[1], [0], [0], [1], [0, 0, 1, 1], [], []>} : vector<256x128xbf16>, vector<128x128xbf16>, vector<256x128xf32> -> vector<256x128xf32>
    %c0_3 = arith.constant 0 : index
    %c0_4 = arith.constant 0 : index
    %3 = vector.load %arg4[%c0_3, %c0_4] : memref<1x128xf32, #tpu.memory_space<vmem>>, vector<1x128xf32>
    %4 = vector.broadcast %3 : vector<1x128xf32> to vector<256x128xf32>
    %5 = arith.addf %2, %4 : vector<256x128xf32>
    %cst_5 = arith.constant 0.000000e+00 : f32
    %6 = vector.broadcast %cst_5 : f32 to vector<256x128xf32>
    %7 = arith.maximumf %5, %6 : vector<256x128xf32>
    %8 = arith.truncf %7 : vector<256x128xf32> to vector<256x128xbf16>
    %c0_6 = arith.constant 0 : index
    %c0_7 = arith.constant 0 : index
    %9 = vector.load %arg5[%c0_6, %c0_7] : memref<128x128xbf16, #tpu.memory_space<vmem>>, vector<128x128xbf16>
    %cst_8 = arith.constant dense<0.000000e+00> : vector<256x128xf32>
    %10 = tpu.matmul %8, %9, %cst_8 {dimension_numbers = #tpu.dot_dimension_numbers<[1], [0], [0], [1], [0, 0, 1, 1], [], []>} : vector<256x128xbf16>, vector<128x128xbf16>, vector<256x128xf32> -> vector<256x128xf32>
    %c0_9 = arith.constant 0 : index
    %c0_10 = arith.constant 0 : index
    %c0_11 = arith.constant 0 : index
    %11 = vector.load %arg1[%c0_9, %c0_10, %c0_11] : memref<1x256x256xbf16, #tpu.memory_space<vmem>>, vector<1x256x256xbf16>
    %12 = vector.shape_cast %11 : vector<1x256x256xbf16> to vector<256x256xbf16>
    %13 = arith.truncf %10 : vector<256x128xf32> to vector<256x128xbf16>
    %cst_12 = arith.constant dense<0.000000e+00> : vector<256x128xf32>
    %14 = tpu.matmul %12, %13, %cst_12 {dimension_numbers = #tpu.dot_dimension_numbers<[1], [0], [0], [1], [0, 0, 1, 1], [], []>} : vector<256x256xbf16>, vector<256x128xbf16>, vector<256x128xf32> -> vector<256x128xf32>
    %c0_13 = arith.constant 0 : index
    %c0_14 = arith.constant 0 : index
    %15 = vector.load %arg6[%c0_13, %c0_14] : memref<1x128xf32, #tpu.memory_space<vmem>>, vector<1x128xf32>
    %16 = vector.broadcast %15 : vector<1x128xf32> to vector<256x128xf32>
    %17 = arith.addf %14, %16 : vector<256x128xf32>
    %cst_15 = arith.constant 0.000000e+00 : f32
    %18 = vector.broadcast %cst_15 : f32 to vector<256x128xf32>
    %19 = arith.maximumf %17, %18 : vector<256x128xf32>
    %20 = arith.truncf %19 : vector<256x128xf32> to vector<256x128xbf16>
    %c0_16 = arith.constant 0 : index
    %c0_17 = arith.constant 0 : index
    %21 = vector.load %arg7[%c0_16, %c0_17] : memref<128x128xbf16, #tpu.memory_space<vmem>>, vector<128x128xbf16>
    %cst_18 = arith.constant dense<0.000000e+00> : vector<256x128xf32>
    %22 = tpu.matmul %20, %21, %cst_18 {dimension_numbers = #tpu.dot_dimension_numbers<[1], [0], [0], [1], [0, 0, 1, 1], [], []>} : vector<256x128xbf16>, vector<128x128xbf16>, vector<256x128xf32> -> vector<256x128xf32>
    %c0_19 = arith.constant 0 : index
    %c0_20 = arith.constant 0 : index
    %c0_21 = arith.constant 0 : index
    %23 = vector.load %arg1[%c0_19, %c0_20, %c0_21] : memref<1x256x256xbf16, #tpu.memory_space<vmem>>, vector<1x256x256xbf16>
    %24 = vector.shape_cast %23 : vector<1x256x256xbf16> to vector<256x256xbf16>
    %25 = arith.truncf %22 : vector<256x128xf32> to vector<256x128xbf16>
    %cst_22 = arith.constant dense<0.000000e+00> : vector<256x128xf32>
    %26 = tpu.matmul %24, %25, %cst_22 {dimension_numbers = #tpu.dot_dimension_numbers<[1], [0], [0], [1], [0, 0, 1, 1], [], []>} : vector<256x256xbf16>, vector<256x128xbf16>, vector<256x128xf32> -> vector<256x128xf32>
    %c0_23 = arith.constant 0 : index
    %c0_24 = arith.constant 0 : index
    %27 = vector.load %arg8[%c0_23, %c0_24] : memref<1x128xf32, #tpu.memory_space<vmem>>, vector<1x128xf32>
    %28 = vector.broadcast %27 : vector<1x128xf32> to vector<256x128xf32>
    %29 = arith.addf %26, %28 : vector<256x128xf32>
    %cst_25 = arith.constant 0.000000e+00 : f32
    %30 = vector.broadcast %cst_25 : f32 to vector<256x128xf32>
    %31 = arith.maximumf %29, %30 : vector<256x128xf32>
    %32 = arith.truncf %31 : vector<256x128xf32> to vector<256x128xbf16>
    %c0_26 = arith.constant 0 : index
    %c0_27 = arith.constant 0 : index
    %33 = vector.load %arg9[%c0_26, %c0_27] : memref<128x128xbf16, #tpu.memory_space<vmem>>, vector<128x128xbf16>
    %cst_28 = arith.constant dense<0.000000e+00> : vector<256x128xf32>
    %34 = tpu.matmul %32, %33, %cst_28 {dimension_numbers = #tpu.dot_dimension_numbers<[1], [0], [0], [1], [0, 0, 1, 1], [], []>} : vector<256x128xbf16>, vector<128x128xbf16>, vector<256x128xf32> -> vector<256x128xf32>
    %c0_29 = arith.constant 0 : index
    %c0_30 = arith.constant 0 : index
    %c0_31 = arith.constant 0 : index
    %35 = vector.load %arg1[%c0_29, %c0_30, %c0_31] : memref<1x256x256xbf16, #tpu.memory_space<vmem>>, vector<1x256x256xbf16>
    %36 = vector.shape_cast %35 : vector<1x256x256xbf16> to vector<256x256xbf16>
    %37 = arith.truncf %34 : vector<256x128xf32> to vector<256x128xbf16>
    %cst_32 = arith.constant dense<0.000000e+00> : vector<256x128xf32>
    %38 = tpu.matmul %36, %37, %cst_32 {dimension_numbers = #tpu.dot_dimension_numbers<[1], [0], [0], [1], [0, 0, 1, 1], [], []>} : vector<256x256xbf16>, vector<256x128xbf16>, vector<256x128xf32> -> vector<256x128xf32>
    %c0_33 = arith.constant 0 : index
    %c0_34 = arith.constant 0 : index
    %39 = vector.load %arg10[%c0_33, %c0_34] : memref<1x128xf32, #tpu.memory_space<vmem>>, vector<1x128xf32>
    %40 = vector.broadcast %39 : vector<1x128xf32> to vector<256x128xf32>
    %41 = arith.addf %38, %40 : vector<256x128xf32>
    %cst_35 = arith.constant 0.000000e+00 : f32
    %42 = vector.broadcast %cst_35 : f32 to vector<256x128xf32>
    %43 = arith.maximumf %41, %42 : vector<256x128xf32>
    %44 = arith.truncf %43 : vector<256x128xf32> to vector<256x128xbf16>
    %c0_36 = arith.constant 0 : index
    %c0_37 = arith.constant 0 : index
    %45 = vector.load %arg11[%c0_36, %c0_37] : memref<128x128xbf16, #tpu.memory_space<vmem>>, vector<128x128xbf16>
    %cst_38 = arith.constant dense<0.000000e+00> : vector<256x128xf32>
    %46 = tpu.matmul %44, %45, %cst_38 {dimension_numbers = #tpu.dot_dimension_numbers<[1], [0], [0], [1], [0, 0, 1, 1], [], []>} : vector<256x128xbf16>, vector<128x128xbf16>, vector<256x128xf32> -> vector<256x128xf32>
    %c0_39 = arith.constant 0 : index
    %c0_40 = arith.constant 0 : index
    %c0_41 = arith.constant 0 : index
    %47 = vector.load %arg1[%c0_39, %c0_40, %c0_41] : memref<1x256x256xbf16, #tpu.memory_space<vmem>>, vector<1x256x256xbf16>
    %48 = vector.shape_cast %47 : vector<1x256x256xbf16> to vector<256x256xbf16>
    %49 = arith.truncf %46 : vector<256x128xf32> to vector<256x128xbf16>
    %cst_42 = arith.constant dense<0.000000e+00> : vector<256x128xf32>
    %50 = tpu.matmul %48, %49, %cst_42 {dimension_numbers = #tpu.dot_dimension_numbers<[1], [0], [0], [1], [0, 0, 1, 1], [], []>} : vector<256x256xbf16>, vector<256x128xbf16>, vector<256x128xf32> -> vector<256x128xf32>
    %c0_43 = arith.constant 0 : index
    %c0_44 = arith.constant 0 : index
    %51 = vector.load %arg12[%c0_43, %c0_44] : memref<1x128xf32, #tpu.memory_space<vmem>>, vector<1x128xf32>
    %52 = vector.broadcast %51 : vector<1x128xf32> to vector<256x128xf32>
    %53 = arith.addf %50, %52 : vector<256x128xf32>
    %c0_45 = arith.constant 0 : index
    %c0_46 = arith.constant 0 : index
    %54 = vector.load %arg13[%c0_45, %c0_46] : memref<256x128xf32, #tpu.memory_space<vmem>>, vector<256x128xf32>
    tpu.vector_store %arg13[%c0_45, %c0_46], %53 {strides = array<i32>} : memref<256x128xf32, #tpu.memory_space<vmem>>, vector<256x128xf32>,
    return
  }
  func.func @transform_0(%arg0: i32) -> (i32, i32, i32) {
    %c0_i32 = arith.constant 0 : i32
    %c0_i32_0 = arith.constant 0 : i32
    %c0_i32_1 = arith.constant 0 : i32
    return %arg0, %c0_i32, %c0_i32_0 : i32, i32, i32
  }
  func.func @transform_1(%arg0: i32) -> (i32, i32) {
    %c0_i32 = arith.constant 0 : i32
    %c0_i32_0 = arith.constant 0 : i32
    return %arg0, %c0_i32 : i32, i32
  }
  func.func @transform_2(%arg0: i32) -> (i32, i32) {
    %c0_i32 = arith.constant 0 : i32
    %c0_i32_0 = arith.constant 0 : i32
    %c0_i32_1 = arith.constant 0 : i32
    return %c0_i32, %c0_i32_0 : i32, i32
  }
  func.func @transform_3(%arg0: i32) -> (i32, i32) {
    %c0_i32 = arith.constant 0 : i32
    %c0_i32_0 = arith.constant 0 : i32
    %c0_i32_1 = arith.constant 0 : i32
    return %c0_i32, %c0_i32_0 : i32, i32
  }
  func.func @transform_4(%arg0: i32) -> (i32, i32) {
    %c0_i32 = arith.constant 0 : i32
    %c0_i32_0 = arith.constant 0 : i32
    %c0_i32_1 = arith.constant 0 : i32
    return %c0_i32, %c0_i32_0 : i32, i32
  }
  func.func @transform_5(%arg0: i32) -> (i32, i32) {
    %c0_i32 = arith.constant 0 : i32
    %c0_i32_0 = arith.constant 0 : i32
    %c0_i32_1 = arith.constant 0 : i32
    return %c0_i32, %c0_i32_0 : i32, i32
  }
  func.func @transform_6(%arg0: i32) -> (i32, i32) {
    %c0_i32 = arith.constant 0 : i32
    %c0_i32_0 = arith.constant 0 : i32
    %c0_i32_1 = arith.constant 0 : i32
    return %c0_i32, %c0_i32_0 : i32, i32
  }
  func.func @transform_7(%arg0: i32) -> (i32, i32) {
    %c0_i32 = arith.constant 0 : i32
    %c0_i32_0 = arith.constant 0 : i32
    %c0_i32_1 = arith.constant 0 : i32
    return %c0_i32, %c0_i32_0 : i32, i32
  }
  func.func @transform_8(%arg0: i32) -> (i32, i32) {
    %c0_i32 = arith.constant 0 : i32
    %c0_i32_0 = arith.constant 0 : i32
    %c0_i32_1 = arith.constant 0 : i32
    return %c0_i32, %c0_i32_0 : i32, i32
  }
  func.func @transform_9(%arg0: i32) -> (i32, i32) {
    %c0_i32 = arith.constant 0 : i32
    %c0_i32_0 = arith.constant 0 : i32
    %c0_i32_1 = arith.constant 0 : i32
    return %c0_i32, %c0_i32_0 : i32, i32
  }
  func.func @transform_10(%arg0: i32) -> (i32, i32) {
    %c0_i32 = arith.constant 0 : i32
    %c0_i32_0 = arith.constant 0 : i32
    %c0_i32_1 = arith.constant 0 : i32
    return %c0_i32, %c0_i32_0 : i32, i32
  }
  func.func @transform_11(%arg0: i32) -> (i32, i32) {
    %c0_i32 = arith.constant 0 : i32
    %c0_i32_0 = arith.constant 0 : i32
    %c0_i32_1 = arith.constant 0 : i32
    return %c0_i32, %c0_i32_0 : i32, i32
  }
  func.func @transform_12(%arg0: i32) -> (i32, i32) {
    %c0_i32 = arith.constant 0 : i32
    %c0_i32_0 = arith.constant 0 : i32
    return %arg0, %c0_i32 : i32, i32
  }
}

</mosaic_0001>

<bundles_post_ra>
// kernel: _lambda_.1
= control target key start
LH: loop header
LB: loop body
LE: loop exit
PB: predicated region body
PF: predicated region fallthrough
CT: control target
= control target key end

     0   :  { %s4473_s2 = inlined_call_operand.vmem [shape: bf16[128,128], index: 2, kind: input, shape index: {}]   ;;  %s4474_s1 = inlined_call_operand.vmem [shape: bf16[256,128], index: 1, kind: input, shape index: {}]   ;;  %s4475_s4 = inlined_call_operand.vmem [shape: bf16[128,128], index: 4, kind: input, shape index: {}]   ;;  %s4476_s3 = inlined_call_operand.vmem [shape: f32[1,128], index: 3, kind: input, shape index: {}]   ;;  %s4477_s0 = inlined_call_operand.vmem [shape: bf16[1,256,256], index: 0, kind: input, shape index: {}]   ;;  %s4478_s6 = inlined_call_operand.vmem [shape: bf16[128,128], index: 6, kind: input, shape index: {}]   ;;  %s4479_s5 = inlined_call_operand.vmem [shape: f32[1,128], index: 5, kind: input, shape index: {}]   ;;  %s4480_s8 = inlined_call_operand.vmem [shape: bf16[128,128], index: 8, kind: input, shape index: {}]   ;;  %s4481_s7 = inlined_call_operand.vmem [shape: f32[1,128], index: 7, kind: input, shape index: {}]   ;;  %s4482_s10 = inlined_call_operand.vmem [shape: bf16[128,128], index: 10, kind: input, shape index: {}]   ;;  %s4483_s9 = inlined_call_operand.vmem [shape: f32[1,128], index: 9, kind: input, shape index: {}]   ;;  %s4484_s11 = inlined_call_operand.vmem [shape: f32[1,128], index: 11, kind: input, shape index: {}]   ;;  %s4485_s12 = inlined_call_operand.vmem [shape: f32[256,128], index: 12, kind: output, shape index: {}]  }
   0x1   :  { %v3375_v0 = vld [vmem:[%s4473_s2] sm:$0xff]   ;;  %v3376_v1 = vld [vmem:[%s4473_s2 + $0x8] sm:$0xff]   ;;  %v3377_v2 = vld [vmem:[%s4473_s2 + $0x10] sm:$0xff]  }
   0x2   :  { %3119 = vmatprep.subr.bf16.mxu0 %v3375_v0  ;;  %v3378_v3 = vld [vmem:[%s4473_s2 + $0x18] sm:$0xff]   ;;  %v3383_v4 = vld [vmem:[%s4474_s1] sm:$0xff]   ;;  %v3380_v6 = vld [vmem:[%s4473_s2 + $0x28] sm:$0xff]  }
   0x3   :  { %3120 = vmatpush3.bf16.msra.mxu0 %v3375_v0  ;;  %3135 = vmatprep.mubr.bf16.mxu0 %v3383_v4  ;;  %v3379_v5 = vld [vmem:[%s4473_s2 + $0x20] sm:$0xff]   ;;  %v3381_v7 = vld [vmem:[%s4473_s2 + $0x30] sm:$0xff]   ;;  %v3382_v8 = vld [vmem:[%s4473_s2 + $0x38] sm:$0xff]  }
   0x4   :  { %3121 = vmatprep.subr.bf16.mxu0 %v3376_v1  ;;  %v3399_v9 = vld [vmem:[%s4475_s4] sm:$0xff]   ;;  %v3400_v10 = vld [vmem:[%s4475_s4 + $0x8] sm:$0xff]   ;;  %v3401_v12 = vld [vmem:[%s4475_s4 + $0x10] sm:$0xff]  }
   0x5   :  { %3359 = vmatprep.subr.bf16.mxu1 %v3399_v9  ;;  %v3384_v11 = vld [vmem:[%s4474_s1 + $0x8] sm:$0xff]   ;;  %v3385_v13 = vld [vmem:[%s4474_s1 + $0x10] sm:$0xff]   ;;  %v3402_v14 = vld [vmem:[%s4475_s4 + $0x18] sm:$0xff]  }
   0x6   :  { %3367 = vmatpush3.bf16.msra.mxu1 %v3399_v9  ;;  %v3386_v15 = vld [vmem:[%s4474_s1 + $0x18] sm:$0xff]   ;;  %v3387_v16 = vld [vmem:[%s4474_s1 + $0x20] sm:$0xff]   ;;  %v3404_v18 = vld [vmem:[%s4475_s4 + $0x28] sm:$0xff]  }
   0x7   :  { %3122 = vmatpush3.bf16.msra.mxu0 %v3376_v1  ;;  %3360 = vmatprep.subr.bf16.mxu1 %v3400_v10  ;;  %v3403_v17 = vld [vmem:[%s4475_s4 + $0x20] sm:$0xff]   ;;  %v3388_v19 = vld [vmem:[%s4474_s1 + $0x28] sm:$0xff]   ;;  %v3389_v20 = vld [vmem:[%s4474_s1 + $0x30] sm:$0xff]  }
   0x8   :  { %3123 = vmatprep.subr.bf16.mxu0 %v3377_v2  ;;  %v3390_v21 = vld [vmem:[%s4474_s1 + $0x38] sm:$0xff]   ;;  %v3391_v22 = vld [vmem:[%s4474_s1 + $0x40] sm:$0xff]   ;;  %v3392_v23 = vld [vmem:[%s4474_s1 + $0x48] sm:$0xff]  }
   0x9   :  { %v3393_v24 = vld [vmem:[%s4474_s1 + $0x50] sm:$0xff]   ;;  %v3394_v25 = vld [vmem:[%s4474_s1 + $0x58] sm:$0xff]   ;;  %v3395_v26 = vld [vmem:[%s4474_s1 + $0x60] sm:$0xff]  }
   0xa   :  { %3368 = vmatpush3.bf16.msra.mxu1 %v3400_v10  ;;  %v3396_v27 = vld [vmem:[%s4474_s1 + $0x68] sm:$0xff]   ;;  %v3397_v28 = vld [vmem:[%s4474_s1 + $0x70] sm:$0xff]   ;;  %v3398_v29 = vld [vmem:[%s4474_s1 + $0x78] sm:$0xff]  }
   0xb   :  { %3124 = vmatpush3.bf16.msra.mxu0 %v3377_v2  ;;  %3361 = vmatprep.subr.bf16.mxu1 %v3401_v12  ;;  %v3405_v30 = vld [vmem:[%s4475_s4 + $0x30] sm:$0xff]   ;;  %v3406_v31 = vld [vmem:[%s4475_s4 + $0x38] sm:$0xff]   ;;  %v3675_v32 = vld [vmem:[%s4476_s3] ss:$0 sm:$0xff] }
   0xc   :  { %3125 = vmatprep.subr.bf16.mxu0 %v3378_v3 }
   0xe   :  { %3369 = vmatpush3.bf16.msra.mxu1 %v3401_v12 }
   0xf   :  { %3126 = vmatpush3.bf16.msra.mxu0 %v3378_v3  ;;  %3362 = vmatprep.subr.bf16.mxu1 %v3402_v14 }
  0x10   :  { %3127 = vmatprep.subr.bf16.mxu0 %v3379_v5 }
  0x12   :  { %3370 = vmatpush3.bf16.msra.mxu1 %v3402_v14 }
  0x13   :  { %3128 = vmatpush3.bf16.msra.mxu0 %v3379_v5  ;;  %3363 = vmatprep.subr.bf16.mxu1 %v3403_v17 }
  0x14   :  { %3129 = vmatprep.subr.bf16.mxu0 %v3380_v6 }
  0x16   :  { %3371 = vmatpush3.bf16.msra.mxu1 %v3403_v17 }
  0x17   :  { %3130 = vmatpush3.bf16.msra.mxu0 %v3380_v6  ;;  %3364 = vmatprep.subr.bf16.mxu1 %v3404_v18 }
  0x18   :  { %3131 = vmatprep.subr.bf16.mxu0 %v3381_v7 }
  0x1a   :  { %3372 = vmatpush3.bf16.msra.mxu1 %v3404_v18 }
  0x1b   :  { %3132 = vmatpush3.bf16.msra.mxu0 %v3381_v7  ;;  %3365 = vmatprep.subr.bf16.mxu1 %v3405_v30 }
  0x1c   :  { %3133 = vmatprep.subr.bf16.mxu0 %v3382_v8 }
  0x1e   :  { %3373 = vmatpush3.bf16.msra.mxu1 %v3405_v30 }
  0x1f   :  { %3134 = vmatpush3.bf16.msra.mxu0 %v3382_v8  ;;  %3366 = vmatprep.subr.bf16.mxu1 %v3406_v31 }
  0x20   :  { %3167 = vmatprep.subr.bf16.mxu0 %v3399_v9 }
  0x22   :  { %3136 = vmatmul.mubr.bf16.vlgmr.msra.gmra.mrb[0].mxu0 %v3384_v11  ;;  %3374 = vmatpush3.bf16.msra.mxu1 %v3406_v31 }
  0x23   :  { %3139 = vmatprep.mubr.bf16.mxu0 %v3385_v13  ;;  %3168 = vmatpush3.bf16.msra.mxu0 %v3399_v9 }
  0x24   :  { %3169 = vmatprep.subr.bf16.mxu0 %v3400_v10 }
  0x27   :  { %3170 = vmatpush3.bf16.msra.mxu0 %v3400_v10 }
  0x28   :  { %3171 = vmatprep.subr.bf16.mxu0 %v3401_v12 }
  0x2a   :  { %3140 = vmatmul.mubr.bf16.gmra.mrb[4].mxu0 %v3386_v15 }
  0x2b   :  { %3143 = vmatprep.mubr.bf16.mxu0 %v3387_v16  ;;  %3172 = vmatpush3.bf16.msra.mxu0 %v3401_v12 }
  0x2c   :  { %3173 = vmatprep.subr.bf16.mxu0 %v3402_v14 }
  0x2f   :  { %3174 = vmatpush3.bf16.msra.mxu0 %v3402_v14 }
  0x30   :  { %3175 = vmatprep.subr.bf16.mxu0 %v3403_v17 }
  0x32   :  { %3144 = vmatmul.mubr.bf16.gmra.mrb[8].mxu0 %v3388_v19 }
  0x33   :  { %3147 = vmatprep.mubr.bf16.mxu0 %v3389_v20  ;;  %3176 = vmatpush3.bf16.msra.mxu0 %v3403_v17 }
  0x34   :  { %3177 = vmatprep.subr.bf16.mxu0 %v3404_v18 }
  0x37   :  { %3178 = vmatpush3.bf16.msra.mxu0 %v3404_v18 }
  0x38   :  { %3179 = vmatprep.subr.bf16.mxu0 %v3405_v30 }
  0x3a   :  { %3148 = vmatmul.mubr.bf16.gmra.mrb[12].mxu0 %v3390_v21 }
  0x3b   :  { %3151 = vmatprep.mubr.bf16.mxu0 %v3391_v22  ;;  %3180 = vmatpush3.bf16.msra.mxu0 %v3405_v30 }
  0x3c   :  { %3181 = vmatprep.subr.bf16.mxu0 %v3406_v31 }
  0x3f   :  { %3182 = vmatpush3.bf16.msra.mxu0 %v3406_v31 }
  0x42   :  { %3152 = vmatmul.mubr.bf16.gmra.mrb[16].mxu0 %v3392_v23 }
  0x43   :  { %3155 = vmatprep.mubr.bf16.mxu0 %v3393_v24 }
  0x4a   :  { %3156 = vmatmul.mubr.bf16.gmra.mrb[20].mxu0 %v3394_v25 }
  0x4b   :  { %3159 = vmatprep.mubr.bf16.mxu0 %v3395_v26 }
  0x52   :  { %3160 = vmatmul.mubr.bf16.gmra.mrb[24].mxu0 %v3396_v27 }
  0x53   :  { %3163 = vmatprep.mubr.bf16.mxu0 %v3397_v28 }
  0x5a   :  { %3164 = vmatmul.mubr.bf16.gmra.mrb[28].mxu0 %v3398_v29 }
  0xf5   :  { %v3137_v33 = vpop.f32.mrb[0].mxu0 }
  0xf6   :  { %v284_v34 = vadd.f32 %v3137_v33, %v3675_v32  ;;  %v275_v35 = vpop.f32.mrb[1].mxu0 }
  0xf7   :  { %v276_v36 = vadd.f32 %v3675_v32, %v275_v35  ;;  %v3138_v37 = vpop.f32.mrb[2].mxu0 }
  0xf8   :  { %v287_v38 = vadd.f32 %v3138_v37, %v3675_v32  ;;  %v278_v39 = vpop.f32.mrb[3].mxu0  ;;  %v404_v41 = vmax.f32 %v284_v34, 0.0 }
  0xf9   :  { %v279_v40 = vadd.f32 %v3675_v32, %v278_v39  ;;  %v402_v43 = vmax.f32 %v276_v36, 0.0 }
  0xfa   :  { %v405_v42 = vmax.f32 %v287_v38, 0.0 }
  0xfb   :  { %v403_v44 = vmax.f32 %v279_v40, 0.0 }
  0xfc   :  { %v435_v45 = vpack.c.bf16 %v405_v42, %v404_v41 }
  0xfd   :  { %v434_v46 = vpack.c.bf16 %v403_v44, %v402_v43  ;;  %v3141_v47 = vpop.f32.mrb[4].mxu0 }
  0xfe   :  { %v300_v48 = vadd.f32 %v3141_v47, %v3675_v32  ;;  %v291_v49 = vpop.f32.mrb[5].mxu0 }
  0xff   :  { %v292_v50 = vadd.f32 %v3675_v32, %v291_v49  ;;  %v3142_v51 = vpop.f32.mrb[6].mxu0  ;;  %3183 = vmatprep.mubr.bf16.mxu0 %v434_v46 }
 0x100   :  { %v303_v52 = vadd.f32 %v3142_v51, %v3675_v32  ;;  %v294_v53 = vpop.f32.mrb[7].mxu0  ;;  %3184 = vmatmul.mubr.bf16.vlgmr.msra.gmra.mrb[32].mxu0 %v435_v45  ;;  %v408_v55 = vmax.f32 %v300_v48, 0.0 }
 0x101   :  { %v295_v54 = vadd.f32 %v3675_v32, %v294_v53  ;;  %v406_v57 = vmax.f32 %v292_v50, 0.0 }
 0x102   :  { %v409_v56 = vmax.f32 %v303_v52, 0.0 }
 0x103   :  { %v407_v58 = vmax.f32 %v295_v54, 0.0 }
 0x104   :  { %v437_v59 = vpack.c.bf16 %v409_v56, %v408_v55 }
 0x105   :  { %v436_v60 = vpack.c.bf16 %v407_v58, %v406_v57  ;;  %v3145_v61 = vpop.f32.mrb[8].mxu0 }
 0x106   :  { %v316_v62 = vadd.f32 %v3145_v61, %v3675_v32  ;;  %v307_v63 = vpop.f32.mrb[9].mxu0 }
 0x107   :  { %v308_v0 = vadd.f32 %v3675_v32, %v307_v63  ;;  %v3146_v1 = vpop.f32.mrb[10].mxu0  ;;  %3187 = vmatprep.mubr.bf16.mxu0 %v436_v60 }
 0x108   :  { %v319_v2 = vadd.f32 %v3146_v1, %v3675_v32  ;;  %v310_v3 = vpop.f32.mrb[11].mxu0  ;;  %3188 = vmatmul.mubr.bf16.gmra.mrb[36].mxu0 %v437_v59  ;;  %v412_v5 = vmax.f32 %v316_v62, 0.0 }
 0x109   :  { %v311_v4 = vadd.f32 %v3675_v32, %v310_v3  ;;  %v410_v7 = vmax.f32 %v308_v0, 0.0 }
 0x10a   :  { %v413_v6 = vmax.f32 %v319_v2, 0.0 }
 0x10b   :  { %v411_v8 = vmax.f32 %v311_v4, 0.0 }
 0x10c   :  { %v439_v9 = vpack.c.bf16 %v413_v6, %v412_v5 }
 0x10d   :  { %v438_v10 = vpack.c.bf16 %v411_v8, %v410_v7  ;;  %v3149_v11 = vpop.f32.mrb[12].mxu0 }
 0x10e   :  { %v332_v12 = vadd.f32 %v3149_v11, %v3675_v32  ;;  %v323_v13 = vpop.f32.mrb[13].mxu0 }
 0x10f   :  { %v324_v14 = vadd.f32 %v3675_v32, %v323_v13  ;;  %v3150_v15 = vpop.f32.mrb[14].mxu0  ;;  %3191 = vmatprep.mubr.bf16.mxu0 %v438_v10 }
 0x110   :  { %v335_v16 = vadd.f32 %v3150_v15, %v3675_v32  ;;  %v326_v17 = vpop.f32.mrb[15].mxu0  ;;  %3192 = vmatmul.mubr.bf16.gmra.mrb[40].mxu0 %v439_v9  ;;  %v416_v19 = vmax.f32 %v332_v12, 0.0 }
 0x111   :  { %v327_v18 = vadd.f32 %v3675_v32, %v326_v17  ;;  %v414_v21 = vmax.f32 %v324_v14, 0.0 }
 0x112   :  { %v417_v20 = vmax.f32 %v335_v16, 0.0 }
 0x113   :  { %v415_v22 = vmax.f32 %v327_v18, 0.0  ;;  %v3712_v18 = vld [vmem:[%s4477_s0 + $0x4] ss:$8 sps:$4 sm:$0xff]  }
 0x114   :  { %v441_v23 = vpack.c.bf16 %v417_v20, %v416_v19 }
 0x115   :  { %v440_v24 = vpack.c.bf16 %v415_v22, %v414_v21  ;;  %v3153_v25 = vpop.f32.mrb[16].mxu0 }
 0x116   :  { %v348_v26 = vadd.f32 %v3153_v25, %v3675_v32  ;;  %v339_v27 = vpop.f32.mrb[17].mxu0 }
 0x117   :  { %v340_v28 = vadd.f32 %v3675_v32, %v339_v27  ;;  %v3154_v29 = vpop.f32.mrb[18].mxu0  ;;  %3195 = vmatprep.mubr.bf16.mxu0 %v440_v24 }
 0x118   :  { %v351_v30 = vadd.f32 %v3154_v29, %v3675_v32  ;;  %v342_v31 = vpop.f32.mrb[19].mxu0  ;;  %3196 = vmatmul.mubr.bf16.gmra.mrb[44].mxu0 %v441_v23  ;;  %v420_v34 = vmax.f32 %v348_v26, 0.0 }
 0x119   :  { %v343_v33 = vadd.f32 %v3675_v32, %v342_v31  ;;  %v418_v36 = vmax.f32 %v340_v28, 0.0  ;;  %922 = vmatprep.mubr.bf16.mxu0 %v3712_v18 }
 0x11a   :  { %v421_v35 = vmax.f32 %v351_v30, 0.0 }
 0x11b   :  { %v419_v37 = vmax.f32 %v343_v33, 0.0 }
 0x11c   :  { %v443_v38 = vpack.c.bf16 %v421_v35, %v420_v34 }
 0x11d   :  { %v3157_v39 = vpop.f32.mrb[20].mxu0  ;;  %v442_v40 = vpack.c.bf16 %v419_v37, %v418_v36 }
 0x11e   :  { %v364_v41 = vadd.f32 %v3157_v39, %v3675_v32  ;;  %v355_v42 = vpop.f32.mrb[21].mxu0 }
 0x11f   :  { %v356_v43 = vadd.f32 %v3675_v32, %v355_v42  ;;  %v3158_v44 = vpop.f32.mrb[22].mxu0  ;;  %3199 = vmatprep.mubr.bf16.mxu1 %v442_v40 }
 0x120   :  { %v367_v45 = vadd.f32 %v3158_v44, %v3675_v32  ;;  %v358_v46 = vpop.f32.mrb[23].mxu0  ;;  %3200 = vmatmul.mubr.bf16.vlgmr.msra.gmra.mrb[0].mxu1 %v443_v38  ;;  %v424_v48 = vmax.f32 %v364_v41, 0.0 }
 0x121   :  { %v359_v47 = vadd.f32 %v3675_v32, %v358_v46  ;;  %v422_v50 = vmax.f32 %v356_v43, 0.0 }
 0x122   :  { %v425_v49 = vmax.f32 %v367_v45, 0.0 }
 0x123   :  { %v423_v51 = vmax.f32 %v359_v47, 0.0 }
 0x124   :  { %v445_v52 = vpack.c.bf16 %v425_v49, %v424_v48 }
 0x125   :  { %v444_v53 = vpack.c.bf16 %v423_v51, %v422_v50  ;;  %v3161_v54 = vpop.f32.mrb[24].mxu0 }
 0x126   :  { %v380_v55 = vadd.f32 %v3161_v54, %v3675_v32  ;;  %v371_v56 = vpop.f32.mrb[25].mxu0 }
 0x127   :  { %v372_v57 = vadd.f32 %v3675_v32, %v371_v56  ;;  %v3162_v58 = vpop.f32.mrb[26].mxu0  ;;  %3203 = vmatprep.mubr.bf16.mxu1 %v444_v53 }
 0x128   :  { %v383_v59 = vadd.f32 %v3162_v58, %v3675_v32  ;;  %v374_v60 = vpop.f32.mrb[27].mxu0  ;;  %3204 = vmatmul.mubr.bf16.gmra.mrb[4].mxu1 %v445_v52  ;;  %v428_v62 = vmax.f32 %v380_v55, 0.0 }
 0x129   :  { %v375_v61 = vadd.f32 %v3675_v32, %v374_v60  ;;  %v426_v0 = vmax.f32 %v372_v57, 0.0 }
 0x12a   :  { %v429_v63 = vmax.f32 %v383_v59, 0.0 }
 0x12b   :  { %v427_v1 = vmax.f32 %v375_v61, 0.0 }
 0x12c   :  { %v447_v2 = vpack.c.bf16 %v429_v63, %v428_v62 }
 0x12d   :  { %v446_v3 = vpack.c.bf16 %v427_v1, %v426_v0  ;;  %v3165_v4 = vpop.f32.mrb[28].mxu0 }
 0x12e   :  { %v396_v5 = vadd.f32 %v3165_v4, %v3675_v32  ;;  %v387_v6 = vpop.f32.mrb[29].mxu0  ;;  %v3721_v4 = vld [vmem:[%s4477_s0] ss:$8 sps:$4 sm:$0xff]  }
 0x12f   :  { %v388_v7 = vadd.f32 %v3675_v32, %v387_v6  ;;  %v3166_v8 = vpop.f32.mrb[30].mxu0  ;;  %3207 = vmatprep.mubr.bf16.mxu1 %v446_v3  ;;  %v3455_v3 = vld [vmem:[%s4478_s6] sm:$0xff]   ;;  %v3729_v6 = vld [vmem:[%s4477_s0 + $0x14] ss:$8 sps:$4 sm:$0xff]  }
 0x130   :  { %v399_v9 = vadd.f32 %v3166_v8, %v3675_v32  ;;  %v390_v10 = vpop.f32.mrb[31].mxu0  ;;  %3208 = vmatmul.mubr.bf16.gmra.mrb[8].mxu1 %v447_v2  ;;  %v432_v12 = vmax.f32 %v396_v5, 0.0  ;;  %v3456_v5 = vld [vmem:[%s4478_s6 + $0x8] sm:$0xff]   ;;  %3215 = vmatprep.subr.bf16.mxu1 %v3455_v3  ;;  %v3739_v8 = vld [vmem:[%s4477_s0 + $0x10] ss:$8 sps:$4 sm:$0xff]  }
 0x131   :  { %v391_v11 = vadd.f32 %v3675_v32, %v390_v10  ;;  %v430_v14 = vmax.f32 %v388_v7, 0.0  ;;  %v3457_v7 = vld [vmem:[%s4478_s6 + $0x10] sm:$0xff]   ;;  %3216 = vmatpush3.bf16.msra.mxu1 %v3455_v3  ;;  %v3751_v10 = vld [vmem:[%s4477_s0 + $0x20] ss:$8 sps:$4 sm:$0xff]  }
 0x132   :  { %v433_v13 = vmax.f32 %v399_v9, 0.0  ;;  %3217 = vmatprep.subr.bf16.mxu1 %v3456_v5  ;;  %v3744_v9 = vld [vmem:[%s4477_s0 + $0x24] ss:$8 sps:$4 sm:$0xff]  }
 0x133   :  { %v431_v15 = vmax.f32 %v391_v11, 0.0  ;;  %v3756_v11 = vld [vmem:[%s4477_s0 + $0x34] ss:$8 sps:$4 sm:$0xff]  }
 0x134   :  { %v449_v16 = vpack.c.bf16 %v433_v13, %v432_v12  ;;  %v3763_v12 = vld [vmem:[%s4477_s0 + $0x30] ss:$8 sps:$4 sm:$0xff]   ;;  %v3768_v13 = vld [vmem:[%s4477_s0 + $0x44] ss:$8 sps:$4 sm:$0xff]  }
 0x135   :  { %v448_v17 = vpack.c.bf16 %v431_v15, %v430_v14  ;;  %3218 = vmatpush3.bf16.msra.mxu1 %v3456_v5  ;;  %v3775_v14 = vld [vmem:[%s4477_s0 + $0x40] ss:$8 sps:$4 sm:$0xff]   ;;  %v3780_v15 = vld [vmem:[%s4477_s0 + $0x54] ss:$8 sps:$4 sm:$0xff]  }
 0x136   :  { %3219 = vmatprep.subr.bf16.mxu1 %v3457_v7 }
 0x137   :  { %3211 = vmatprep.mubr.bf16.mxu1 %v448_v17  ;;  %v3792_v17 = vld [vmem:[%s4477_s0 + $0x64] ss:$8 sps:$4 sm:$0xff]  }
 0x138   :  { %3212 = vmatmul.mubr.bf16.gmra.mrb[12].mxu1 %v449_v16  ;;  %v3787_v16 = vld [vmem:[%s4477_s0 + $0x50] ss:$8 sps:$4 sm:$0xff]  }
 0x139   :  { %3220 = vmatpush3.bf16.msra.mxu1 %v3457_v7 }
 0x1d3   :  { %v3185_v19 = vpop.f32.mrb[32].mxu0 }
 0x1d4   :  { %v548_v20 = vpop.f32.mrb[33].mxu0 }
 0x1d5   :  { %v3186_v21 = vpop.f32.mrb[34].mxu0 }
 0x1d6   :  { %v708_v22 = vpack.c.bf16 %v3186_v21, %v3185_v19  ;;  %v551_v32 = vpop.f32.mrb[35].mxu0  ;;  %v3799_v19 = vld [vmem:[%s4477_s0 + $0x60] ss:$8 sps:$4 sm:$0xff]   ;;  %v3811_v21 = vld [vmem:[%s4477_s0 + $0x70] ss:$8 sps:$4 sm:$0xff]  }
 0x1d7   :  { %v707_v23 = vpack.c.bf16 %v551_v32, %v548_v20  ;;  %v3804_v20 = vld [vmem:[%s4477_s0 + $0x74] ss:$8 sps:$4 sm:$0xff]   ;;  %v3823_v32 = vld [vmem:[%s4477_s0 + $0x80] ss:$8 sps:$4 sm:$0xff]  }
 0x1db   :  { %v3189_v24 = vpop.f32.mrb[36].mxu0 }
 0x1dc   :  { %v564_v25 = vpop.f32.mrb[37].mxu0 }
 0x1dd   :  { %v3190_v26 = vpop.f32.mrb[38].mxu0 }
 0x1de   :  { %v710_v27 = vpack.c.bf16 %v3190_v26, %v3189_v24  ;;  %v567_v28 = vpop.f32.mrb[39].mxu0  ;;  %v3835_v24 = vld [vmem:[%s4477_s0 + $0x90] ss:$8 sps:$4 sm:$0xff]   ;;  %v3847_v26 = vld [vmem:[%s4477_s0 + $0xa0] ss:$8 sps:$4 sm:$0xff]  }
 0x1df   :  { %v709_v29 = vpack.c.bf16 %v567_v28, %v564_v25  ;;  %v3840_v25 = vld [vmem:[%s4477_s0 + $0xa4] ss:$8 sps:$4 sm:$0xff]   ;;  %v3458_v28 = vld [vmem:[%s4478_s6 + $0x18] sm:$0xff]  }
 0x1e0   :  { %3221 = vmatprep.subr.bf16.mxu1 %v3458_v28 }
 0x1e1   :  { %3222 = vmatpush3.bf16.msra.mxu1 %v3458_v28 }
 0x1e3   :  { %v3193_v30 = vpop.f32.mrb[40].mxu0 }
 0x1e4   :  { %v580_v31 = vpop.f32.mrb[41].mxu0 }
 0x1e5   :  { %v3194_v33 = vpop.f32.mrb[42].mxu0 }
 0x1e6   :  { %v712_v34 = vpack.c.bf16 %v3194_v33, %v3193_v30  ;;  %v583_v35 = vpop.f32.mrb[43].mxu0  ;;  %v3867_v30 = vld [vmem:[%s4477_s0 + $0xc4] ss:$8 sps:$4 sm:$0xff]  }
 0x1e7   :  { %v711_v36 = vpack.c.bf16 %v583_v35, %v580_v31  ;;  %v3459_v31 = vld [vmem:[%s4478_s6 + $0x20] sm:$0xff]   ;;  %v3460_v33 = vld [vmem:[%s4478_s6 + $0x28] sm:$0xff]   ;;  %v3885_v35 = vld [vmem:[%s4477_s0 + $0xd4] ss:$8 sps:$4 sm:$0xff]  }
 0x1e8   :  { %3223 = vmatprep.subr.bf16.mxu1 %v3459_v31 }
 0x1e9   :  { %3224 = vmatpush3.bf16.msra.mxu1 %v3459_v31 }
 0x1ea   :  { %3225 = vmatprep.subr.bf16.mxu1 %v3460_v33 }
 0x1eb   :  { %v3197_v37 = vpop.f32.mrb[44].mxu0 }
 0x1ec   :  { %v596_v38 = vpop.f32.mrb[45].mxu0 }
 0x1ed   :  { %v3198_v39 = vpop.f32.mrb[46].mxu0  ;;  %3226 = vmatpush3.bf16.msra.mxu1 %v3460_v33 }
 0x1ee   :  { %v714_v40 = vpack.c.bf16 %v3198_v39, %v3197_v37  ;;  %v599_v41 = vpop.f32.mrb[47].mxu0  ;;  %v3462_v37 = vld [vmem:[%s4478_s6 + $0x38] sm:$0xff]   ;;  %v3903_v39 = vld [vmem:[%s4477_s0 + $0xe4] ss:$8 sps:$4 sm:$0xff]  }
 0x1ef   :  { %v713_v42 = vpack.c.bf16 %v599_v41, %v596_v38  ;;  %v3898_v38 = vld [vmem:[%s4477_s0 + $0xd0] ss:$8 sps:$4 sm:$0xff]   ;;  %v3915_v41 = vld [vmem:[%s4477_s0 + $0xf4] ss:$8 sps:$4 sm:$0xff]  }
 0x1f3   :  { %v3201_v43 = vpop.f32.mrb[0].mxu1 }
 0x1f4   :  { %v612_v44 = vpop.f32.mrb[1].mxu1 }
 0x1f5   :  { %v3202_v45 = vpop.f32.mrb[2].mxu1 }
 0x1f6   :  { %v716_v46 = vpack.c.bf16 %v3202_v45, %v3201_v43  ;;  %v615_v47 = vpop.f32.mrb[3].mxu1 }
 0x1f7   :  { %v715_v48 = vpack.c.bf16 %v615_v47, %v612_v44  ;;  %v3928_v44 = vld [vmem:[%s4479_s5] ss:$0 sm:$0xff] }
 0x1f9   :  { %2599 = vmatprep.subr.bf16.mxu0 %v715_v48 }
 0x1fa   :  { %2600 = vmatpush3.bf16.msra.mxu0 %v707_v23  ;;  %v3828_v23 = vld [vmem:[%s4477_s0 + $0x94] ss:$8 sps:$4 sm:$0xff]  }
 0x1fb   :  { %v3205_v49 = vpop.f32.mrb[4].mxu1  ;;  %2601 = vmatprep.subr.bf16.mxu0 %v716_v46 }
 0x1fc   :  { %v628_v50 = vpop.f32.mrb[5].mxu1 }
 0x1fd   :  { %v3206_v51 = vpop.f32.mrb[6].mxu1 }
 0x1fe   :  { %v718_v52 = vpack.c.bf16 %v3206_v51, %v3205_v49  ;;  %v631_v53 = vpop.f32.mrb[7].mxu1  ;;  %2602 = vmatpush3.bf16.msra.mxu0 %v708_v22  ;;  %v3816_v22 = vld [vmem:[%s4477_s0 + $0x84] ss:$8 sps:$4 sm:$0xff]  }
 0x1ff   :  { %v717_v54 = vpack.c.bf16 %v631_v53, %v628_v50 }
 0x201   :  { %2603 = vmatprep.subr.bf16.mxu0 %v717_v54 }
 0x202   :  { %2604 = vmatpush3.bf16.msra.mxu0 %v709_v29  ;;  %v3862_v29 = vld [vmem:[%s4477_s0 + $0xb0] ss:$8 sps:$4 sm:$0xff]  }
 0x203   :  { %v3209_v55 = vpop.f32.mrb[8].mxu1  ;;  %2605 = vmatprep.subr.bf16.mxu0 %v718_v52 }
 0x204   :  { %v644_v56 = vpop.f32.mrb[9].mxu1 }
 0x205   :  { %v3210_v57 = vpop.f32.mrb[10].mxu1 }
 0x206   :  { %v720_v58 = vpack.c.bf16 %v3210_v57, %v3209_v55  ;;  %v647_v59 = vpop.f32.mrb[11].mxu1  ;;  %2606 = vmatpush3.bf16.msra.mxu0 %v710_v27  ;;  %v3852_v27 = vld [vmem:[%s4477_s0 + $0xb4] ss:$8 sps:$4 sm:$0xff]  }
 0x207   :  { %v719_v60 = vpack.c.bf16 %v647_v59, %v644_v56 }
 0x209   :  { %2607 = vmatprep.subr.bf16.mxu0 %v719_v60 }
 0x20a   :  { %2608 = vmatpush3.bf16.msra.mxu0 %v711_v36  ;;  %v3461_v36 = vld [vmem:[%s4478_s6 + $0x30] sm:$0xff]  }
 0x20b   :  { %v3213_v61 = vpop.f32.mrb[12].mxu1  ;;  %2609 = vmatprep.subr.bf16.mxu0 %v720_v58  ;;  %3227 = vmatprep.subr.bf16.mxu1 %v3461_v36 }
 0x20c   :  { %v660_v62 = vpop.f32.mrb[13].mxu1  ;;  %3228 = vmatpush3.bf16.msra.mxu1 %v3461_v36 }
 0x20d   :  { %v3214_v63 = vpop.f32.mrb[14].mxu1  ;;  %3229 = vmatprep.subr.bf16.mxu1 %v3462_v37 }
 0x20e   :  { %v722_v0 = vpack.c.bf16 %v3214_v63, %v3213_v61  ;;  %v663_v1 = vpop.f32.mrb[15].mxu1  ;;  %2610 = vmatpush3.bf16.msra.mxu0 %v712_v34  ;;  %v3880_v34 = vld [vmem:[%s4477_s0 + $0xc0] ss:$8 sps:$4 sm:$0xff]  }
 0x20f   :  { %v721_v2 = vpack.c.bf16 %v663_v1, %v660_v62 }
 0x210   :  { %3230 = vmatpush3.bf16.msra.mxu1 %v3462_v37 }
 0x211   :  { %2611 = vmatprep.subr.bf16.mxu0 %v721_v2 }
 0x212   :  { %2612 = vmatpush3.bf16.msra.mxu0 %v713_v42  ;;  %v3922_v42 = vld [vmem:[%s4477_s0 + $0xf0] ss:$8 sps:$4 sm:$0xff]  }
 0x213   :  { %2613 = vmatprep.subr.bf16.mxu0 %v722_v0 }
 0x216   :  { %2614 = vmatpush3.bf16.msra.mxu0 %v714_v40  ;;  %v3910_v40 = vld [vmem:[%s4477_s0 + $0xe0] ss:$8 sps:$4 sm:$0xff]  }
 0x219   :  { %923 = vmatmul.mubr.bf16.vlgmr.msra.gmra.mrb[48].mxu0 %v3721_v4 }
 0x21a   :  { %930 = vmatprep.mubr.bf16.mxu0 %v3729_v6 }
 0x221   :  { %931 = vmatmul.mubr.bf16.gmra.mrb[52].mxu0 %v3739_v8 }
 0x222   :  { %938 = vmatprep.mubr.bf16.mxu0 %v3744_v9 }
 0x229   :  { %939 = vmatmul.mubr.bf16.gmra.mrb[56].mxu0 %v3751_v10 }
 0x22a   :  { %946 = vmatprep.mubr.bf16.mxu0 %v3756_v11 }
 0x231   :  { %947 = vmatmul.mubr.bf16.gmra.mrb[60].mxu0 %v3763_v12 }
 0x232   :  { %954 = vmatprep.mubr.bf16.mxu0 %v3768_v13 }
 0x239   :  { %955 = vmatmul.mubr.bf16.gmra.mrb[64].mxu0 %v3775_v14 }
 0x23a   :  { %962 = vmatprep.mubr.bf16.mxu0 %v3780_v15 }
 0x241   :  { %963 = vmatmul.mubr.bf16.gmra.mrb[68].mxu0 %v3787_v16 }
 0x242   :  { %970 = vmatprep.mubr.bf16.mxu0 %v3792_v17 }
 0x249   :  { %971 = vmatmul.mubr.bf16.gmra.mrb[72].mxu0 %v3799_v19 }
 0x24a   :  { %978 = vmatprep.mubr.bf16.mxu0 %v3804_v20 }
 0x251   :  { %979 = vmatmul.mubr.bf16.gmra.mrb[76].mxu0 %v3811_v21 }
 0x252   :  { %986 = vmatprep.mubr.bf16.mxu0 %v3816_v22 }
 0x259   :  { %987 = vmatmul.mubr.bf16.gmra.mrb[80].mxu0 %v3823_v32 }
 0x25a   :  { %994 = vmatprep.mubr.bf16.mxu0 %v3828_v23 }
 0x261   :  { %995 = vmatmul.mubr.bf16.gmra.mrb[84].mxu0 %v3835_v24 }
 0x262   :  { %1002 = vmatprep.mubr.bf16.mxu0 %v3840_v25 }
 0x269   :  { %1003 = vmatmul.mubr.bf16.gmra.mrb[88].mxu0 %v3847_v26 }
 0x26a   :  { %1010 = vmatprep.mubr.bf16.mxu0 %v3852_v27 }
 0x271   :  { %1011 = vmatmul.mubr.bf16.gmra.mrb[92].mxu0 %v3862_v29 }
 0x272   :  { %1018 = vmatprep.mubr.bf16.mxu0 %v3867_v30 }
 0x279   :  { %1019 = vmatmul.mubr.bf16.gmra.mrb[96].mxu0 %v3880_v34 }
 0x27a   :  { %1026 = vmatprep.mubr.bf16.mxu0 %v3885_v35 }
 0x281   :  { %1027 = vmatmul.mubr.bf16.gmra.mrb[100].mxu0 %v3898_v38 }
 0x282   :  { %1034 = vmatprep.mubr.bf16.mxu0 %v3903_v39 }
 0x289   :  { %1035 = vmatmul.mubr.bf16.gmra.mrb[104].mxu0 %v3910_v40 }
 0x28a   :  { %1042 = vmatprep.mubr.bf16.mxu0 %v3915_v41 }
 0x291   :  { %1043 = vmatmul.mubr.bf16.gmra.mrb[108].mxu0 %v3922_v42 }
 0x2ec   :  { %v2615_v43 = vpop.f32.mrb[48].mxu0 }
 0x2ed   :  { %v2616_v45 = vpop.f32.mrb[49].mxu0 }
 0x2ee   :  { %v2617_v46 = vadd.f32 %v2616_v45, %v2615_v43  ;;  %v2618_v47 = vpop.f32.mrb[50].mxu0 }
 0x2ef   :  { %v2619_v48 = vpop.f32.mrb[51].mxu0 }
 0x2f0   :  { %v925_v49 = vadd.f32 %v2617_v46, %v3928_v44  ;;  %v2620_v50 = vadd.f32 %v2619_v48, %v2618_v47 }
 0x2f2   :  { %v928_v51 = vadd.f32 %v2620_v50, %v3928_v44  ;;  %v1051_v52 = vmax.f32 %v925_v49, 0.0 }
 0x2f4   :  { %v1052_v53 = vmax.f32 %v928_v51, 0.0  ;;  %v2621_v54 = vpop.f32.mrb[52].mxu0 }
 0x2f5   :  { %v2622_v55 = vpop.f32.mrb[53].mxu0 }
 0x2f6   :  { %v2623_v56 = vadd.f32 %v2622_v55, %v2621_v54  ;;  %v2624_v57 = vpop.f32.mrb[54].mxu0  ;;  %v1083_v58 = vpack.c.bf16 %v1052_v53, %v1051_v52 }
 0x2f7   :  { %v2625_v59 = vpop.f32.mrb[55].mxu0 }
 0x2f8   :  { %v933_v60 = vadd.f32 %v2623_v56, %v3928_v44  ;;  %v2626_v61 = vadd.f32 %v2625_v59, %v2624_v57  ;;  %3231 = vmatprep.mubr.bf16.mxu1 %v1083_v58 }
 0x2fa   :  { %v936_v62 = vadd.f32 %v2626_v61, %v3928_v44  ;;  %v1053_v63 = vmax.f32 %v933_v60, 0.0 }
 0x2fc   :  { %v1054_v0 = vmax.f32 %v936_v62, 0.0  ;;  %v2627_v1 = vpop.f32.mrb[56].mxu0 }
 0x2fd   :  { %v2628_v2 = vpop.f32.mrb[57].mxu0 }
 0x2fe   :  { %v1084_v3 = vpack.c.bf16 %v1054_v0, %v1053_v63  ;;  %v2629_v5 = vadd.f32 %v2628_v2, %v2627_v1  ;;  %v2630_v7 = vpop.f32.mrb[58].mxu0 }
 0x2ff   :  { %v2631_v28 = vpop.f32.mrb[59].mxu0 }
 0x300   :  { %v941_v31 = vadd.f32 %v2629_v5, %v3928_v44  ;;  %v2632_v33 = vadd.f32 %v2631_v28, %v2630_v7  ;;  %3232 = vmatmul.mubr.bf16.vlgmr.msra.gmra.mrb[16].mxu1 %v1084_v3 }
 0x302   :  { %v944_v36 = vadd.f32 %v2632_v33, %v3928_v44  ;;  %v1055_v37 = vmax.f32 %v941_v31, 0.0 }
 0x304   :  { %v1056_v43 = vmax.f32 %v944_v36, 0.0  ;;  %v2633_v45 = vpop.f32.mrb[60].mxu0 }
 0x305   :  { %v2634_v46 = vpop.f32.mrb[61].mxu0 }
 0x306   :  { %v2635_v47 = vadd.f32 %v2634_v46, %v2633_v45  ;;  %v2636_v48 = vpop.f32.mrb[62].mxu0  ;;  %v1085_v49 = vpack.c.bf16 %v1056_v43, %v1055_v37 }
 0x307   :  { %v2637_v50 = vpop.f32.mrb[63].mxu0 }
 0x308   :  { %v949_v51 = vadd.f32 %v2635_v47, %v3928_v44  ;;  %v2638_v52 = vadd.f32 %v2637_v50, %v2636_v48  ;;  %3235 = vmatprep.mubr.bf16.mxu1 %v1085_v49 }
 0x30a   :  { %v952_v53 = vadd.f32 %v2638_v52, %v3928_v44  ;;  %v1057_v54 = vmax.f32 %v949_v51, 0.0 }
 0x30c   :  { %v1058_v55 = vmax.f32 %v952_v53, 0.0  ;;  %v2639_v56 = vpop.f32.mrb[64].mxu0 }
 0x30d   :  { %v2640_v57 = vpop.f32.mrb[65].mxu0 }
 0x30e   :  { %v2641_v58 = vadd.f32 %v2640_v57, %v2639_v56  ;;  %v2642_v59 = vpop.f32.mrb[66].mxu0  ;;  %v1086_v60 = vpack.c.bf16 %v1058_v55, %v1057_v54 }
 0x30f   :  { %v2643_v61 = vpop.f32.mrb[67].mxu0 }
 0x310   :  { %v957_v62 = vadd.f32 %v2641_v58, %v3928_v44  ;;  %v2644_v63 = vadd.f32 %v2643_v61, %v2642_v59  ;;  %3236 = vmatmul.mubr.bf16.gmra.mrb[20].mxu1 %v1086_v60 }
 0x312   :  { %v960_v0 = vadd.f32 %v2644_v63, %v3928_v44  ;;  %v1059_v1 = vmax.f32 %v957_v62, 0.0 }
 0x314   :  { %v1060_v2 = vmax.f32 %v960_v0, 0.0  ;;  %v2645_v3 = vpop.f32.mrb[68].mxu0 }
 0x315   :  { %v2646_v5 = vpop.f32.mrb[69].mxu0 }
 0x316   :  { %v2647_v7 = vadd.f32 %v2646_v5, %v2645_v3  ;;  %v2648_v28 = vpop.f32.mrb[70].mxu0  ;;  %v1087_v31 = vpack.c.bf16 %v1060_v2, %v1059_v1 }
 0x317   :  { %v2649_v33 = vpop.f32.mrb[71].mxu0 }
 0x318   :  { %v965_v36 = vadd.f32 %v2647_v7, %v3928_v44  ;;  %v2650_v37 = vadd.f32 %v2649_v33, %v2648_v28  ;;  %3239 = vmatprep.mubr.bf16.mxu1 %v1087_v31 }
 0x31a   :  { %v968_v43 = vadd.f32 %v2650_v37, %v3928_v44  ;;  %v1061_v45 = vmax.f32 %v965_v36, 0.0 }
 0x31c   :  { %v1062_v46 = vmax.f32 %v968_v43, 0.0  ;;  %v2651_v47 = vpop.f32.mrb[72].mxu0 }
 0x31d   :  { %v2652_v48 = vpop.f32.mrb[73].mxu0 }
 0x31e   :  { %v2653_v49 = vadd.f32 %v2652_v48, %v2651_v47  ;;  %v2654_v50 = vpop.f32.mrb[74].mxu0  ;;  %v1088_v51 = vpack.c.bf16 %v1062_v46, %v1061_v45 }
 0x31f   :  { %v2655_v52 = vpop.f32.mrb[75].mxu0 }
 0x320   :  { %v973_v53 = vadd.f32 %v2653_v49, %v3928_v44  ;;  %v2656_v54 = vadd.f32 %v2655_v52, %v2654_v50  ;;  %3240 = vmatmul.mubr.bf16.gmra.mrb[24].mxu1 %v1088_v51 }
 0x322   :  { %v976_v55 = vadd.f32 %v2656_v54, %v3928_v44  ;;  %v1063_v56 = vmax.f32 %v973_v53, 0.0 }
 0x324   :  { %v1064_v57 = vmax.f32 %v976_v55, 0.0  ;;  %v2657_v58 = vpop.f32.mrb[76].mxu0 }
 0x325   :  { %v2658_v59 = vpop.f32.mrb[77].mxu0 }
 0x326   :  { %v2659_v60 = vadd.f32 %v2658_v59, %v2657_v58  ;;  %v2660_v61 = vpop.f32.mrb[78].mxu0  ;;  %v1089_v62 = vpack.c.bf16 %v1064_v57, %v1063_v56 }
 0x327   :  { %v2661_v63 = vpop.f32.mrb[79].mxu0 }
 0x328   :  { %v981_v0 = vadd.f32 %v2659_v60, %v3928_v44  ;;  %v2662_v1 = vadd.f32 %v2661_v63, %v2660_v61  ;;  %3243 = vmatprep.mubr.bf16.mxu1 %v1089_v62 }
 0x32a   :  { %v984_v2 = vadd.f32 %v2662_v1, %v3928_v44  ;;  %v1065_v3 = vmax.f32 %v981_v0, 0.0 }
 0x32c   :  { %v1066_v5 = vmax.f32 %v984_v2, 0.0  ;;  %v2663_v7 = vpop.f32.mrb[80].mxu0 }
 0x32d   :  { %v2664_v28 = vpop.f32.mrb[81].mxu0 }
 0x32e   :  { %v2665_v31 = vadd.f32 %v2664_v28, %v2663_v7  ;;  %v2666_v33 = vpop.f32.mrb[82].mxu0  ;;  %v1090_v36 = vpack.c.bf16 %v1066_v5, %v1065_v3 }
 0x32f   :  { %v2667_v37 = vpop.f32.mrb[83].mxu0 }
 0x330   :  { %v989_v43 = vadd.f32 %v2665_v31, %v3928_v44  ;;  %v2668_v45 = vadd.f32 %v2667_v37, %v2666_v33  ;;  %3244 = vmatmul.mubr.bf16.gmra.mrb[28].mxu1 %v1090_v36 }
 0x332   :  { %v992_v46 = vadd.f32 %v2668_v45, %v3928_v44  ;;  %v1067_v47 = vmax.f32 %v989_v43, 0.0 }
 0x334   :  { %v1068_v48 = vmax.f32 %v992_v46, 0.0  ;;  %v2669_v49 = vpop.f32.mrb[84].mxu0 }
 0x335   :  { %v2670_v50 = vpop.f32.mrb[85].mxu0 }
 0x336   :  { %v2671_v51 = vadd.f32 %v2670_v50, %v2669_v49  ;;  %v2672_v52 = vpop.f32.mrb[86].mxu0  ;;  %v1091_v53 = vpack.c.bf16 %v1068_v48, %v1067_v47 }
 0x337   :  { %v2673_v54 = vpop.f32.mrb[87].mxu0 }
 0x338   :  { %v997_v55 = vadd.f32 %v2671_v51, %v3928_v44  ;;  %v2674_v56 = vadd.f32 %v2673_v54, %v2672_v52  ;;  %3247 = vmatprep.mubr.bf16.mxu1 %v1091_v53 }
 0x33a   :  { %v1000_v57 = vadd.f32 %v2674_v56, %v3928_v44  ;;  %v1069_v58 = vmax.f32 %v997_v55, 0.0 }
 0x33c   :  { %v1070_v59 = vmax.f32 %v1000_v57, 0.0  ;;  %v2675_v60 = vpop.f32.mrb[88].mxu0 }
 0x33d   :  { %v2676_v61 = vpop.f32.mrb[89].mxu0 }
 0x33e   :  { %v2677_v62 = vadd.f32 %v2676_v61, %v2675_v60  ;;  %v2678_v63 = vpop.f32.mrb[90].mxu0  ;;  %v1092_v0 = vpack.c.bf16 %v1070_v59, %v1069_v58 }
 0x33f   :  { %v2679_v1 = vpop.f32.mrb[91].mxu0 }
 0x340   :  { %v1005_v2 = vadd.f32 %v2677_v62, %v3928_v44  ;;  %v2680_v3 = vadd.f32 %v2679_v1, %v2678_v63  ;;  %3248 = vmatmul.mubr.bf16.gmra.mrb[32].mxu1 %v1092_v0 }
 0x342   :  { %v1008_v5 = vadd.f32 %v2680_v3, %v3928_v44  ;;  %v1071_v7 = vmax.f32 %v1005_v2, 0.0 }
 0x344   :  { %v1072_v28 = vmax.f32 %v1008_v5, 0.0  ;;  %v2681_v31 = vpop.f32.mrb[92].mxu0 }
 0x345   :  { %v2682_v33 = vpop.f32.mrb[93].mxu0 }
 0x346   :  { %v2683_v36 = vadd.f32 %v2682_v33, %v2681_v31  ;;  %v2684_v37 = vpop.f32.mrb[94].mxu0  ;;  %v1093_v43 = vpack.c.bf16 %v1072_v28, %v1071_v7 }
 0x347   :  { %v2685_v45 = vpop.f32.mrb[95].mxu0 }
 0x348   :  { %v1013_v46 = vadd.f32 %v2683_v36, %v3928_v44  ;;  %v2686_v47 = vadd.f32 %v2685_v45, %v2684_v37  ;;  %3251 = vmatprep.mubr.bf16.mxu1 %v1093_v43 }
 0x34a   :  { %v1016_v48 = vadd.f32 %v2686_v47, %v3928_v44  ;;  %v1073_v49 = vmax.f32 %v1013_v46, 0.0 }
 0x34c   :  { %v1074_v50 = vmax.f32 %v1016_v48, 0.0  ;;  %v2687_v51 = vpop.f32.mrb[96].mxu0 }
 0x34d   :  { %v2688_v52 = vpop.f32.mrb[97].mxu0 }
 0x34e   :  { %v2689_v53 = vadd.f32 %v2688_v52, %v2687_v51  ;;  %v2690_v54 = vpop.f32.mrb[98].mxu0  ;;  %v1094_v55 = vpack.c.bf16 %v1074_v50, %v1073_v49 }
 0x34f   :  { %v2691_v56 = vpop.f32.mrb[99].mxu0 }
 0x350   :  { %v1021_v57 = vadd.f32 %v2689_v53, %v3928_v44  ;;  %v2692_v58 = vadd.f32 %v2691_v56, %v2690_v54  ;;  %3252 = vmatmul.mubr.bf16.gmra.mrb[36].mxu1 %v1094_v55 }
 0x352   :  { %v1024_v59 = vadd.f32 %v2692_v58, %v3928_v44  ;;  %v1075_v60 = vmax.f32 %v1021_v57, 0.0 }
 0x354   :  { %v1076_v61 = vmax.f32 %v1024_v59, 0.0  ;;  %v2693_v62 = vpop.f32.mrb[100].mxu0 }
 0x355   :  { %v2694_v63 = vpop.f32.mrb[101].mxu0 }
 0x356   :  { %v2695_v0 = vadd.f32 %v2694_v63, %v2693_v62  ;;  %v2696_v1 = vpop.f32.mrb[102].mxu0  ;;  %v1095_v2 = vpack.c.bf16 %v1076_v61, %v1075_v60 }
 0x357   :  { %v2697_v3 = vpop.f32.mrb[103].mxu0 }
 0x358   :  { %v1029_v5 = vadd.f32 %v2695_v0, %v3928_v44  ;;  %v2698_v7 = vadd.f32 %v2697_v3, %v2696_v1  ;;  %3255 = vmatprep.mubr.bf16.mxu1 %v1095_v2 }
 0x35a   :  { %v1032_v28 = vadd.f32 %v2698_v7, %v3928_v44  ;;  %v1077_v31 = vmax.f32 %v1029_v5, 0.0 }
 0x35c   :  { %v1078_v33 = vmax.f32 %v1032_v28, 0.0  ;;  %v2699_v36 = vpop.f32.mrb[104].mxu0 }
 0x35d   :  { %v2700_v37 = vpop.f32.mrb[105].mxu0 }
 0x35e   :  { %v2701_v43 = vadd.f32 %v2700_v37, %v2699_v36  ;;  %v2702_v45 = vpop.f32.mrb[106].mxu0  ;;  %v1096_v46 = vpack.c.bf16 %v1078_v33, %v1077_v31 }
 0x35f   :  { %v2703_v47 = vpop.f32.mrb[107].mxu0 }
 0x360   :  { %v1037_v48 = vadd.f32 %v2701_v43, %v3928_v44  ;;  %v2704_v49 = vadd.f32 %v2703_v47, %v2702_v45  ;;  %3256 = vmatmul.mubr.bf16.gmra.mrb[40].mxu1 %v1096_v46 }
 0x362   :  { %v1040_v50 = vadd.f32 %v2704_v49, %v3928_v44  ;;  %v1079_v51 = vmax.f32 %v1037_v48, 0.0 }
 0x364   :  { %v1080_v52 = vmax.f32 %v1040_v50, 0.0  ;;  %v2705_v53 = vpop.f32.mrb[108].mxu0 }
 0x365   :  { %v2706_v54 = vpop.f32.mrb[109].mxu0 }
 0x366   :  { %v2707_v55 = vadd.f32 %v2706_v54, %v2705_v53  ;;  %v2708_v56 = vpop.f32.mrb[110].mxu0  ;;  %v1097_v57 = vpack.c.bf16 %v1080_v52, %v1079_v51 }
 0x367   :  { %v2709_v58 = vpop.f32.mrb[111].mxu0 }
 0x368   :  { %v1045_v59 = vadd.f32 %v2707_v55, %v3928_v44  ;;  %v2710_v60 = vadd.f32 %v2709_v58, %v2708_v56  ;;  %3259 = vmatprep.mubr.bf16.mxu1 %v1097_v57 }
 0x36a   :  { %v1048_v61 = vadd.f32 %v2710_v60, %v3928_v44  ;;  %v1081_v62 = vmax.f32 %v1045_v59, 0.0 }
 0x36c   :  { %v1082_v63 = vmax.f32 %v1048_v61, 0.0 }
 0x36e   :  { %v1098_v0 = vpack.c.bf16 %v1082_v63, %v1081_v62 }
 0x370   :  { %3260 = vmatmul.mubr.bf16.gmra.mrb[44].mxu1 %v1098_v0 }
 0x371   :  { %1379 = vmatprep.mubr.bf16.mxu1 %v3712_v18 }
 0x3d3   :  { %v3233_v1 = vpop.f32.mrb[16].mxu1 }
 0x3d4   :  { %v1197_v2 = vpop.f32.mrb[17].mxu1 }
 0x3d5   :  { %v3234_v3 = vpop.f32.mrb[18].mxu1 }
 0x3d6   :  { %v1325_v5 = vpack.c.bf16 %v3234_v3, %v3233_v1  ;;  %v1200_v7 = vpop.f32.mrb[19].mxu1 }
 0x3d7   :  { %v1324_v28 = vpack.c.bf16 %v1200_v7, %v1197_v2 }
 0x3e3   :  { %v3237_v31 = vpop.f32.mrb[20].mxu1 }
 0x3e4   :  { %v1213_v33 = vpop.f32.mrb[21].mxu1 }
 0x3e5   :  { %v3238_v36 = vpop.f32.mrb[22].mxu1 }
 0x3e6   :  { %v1327_v37 = vpack.c.bf16 %v3238_v36, %v3237_v31  ;;  %v1216_v43 = vpop.f32.mrb[23].mxu1 }
 0x3e7   :  { %v1326_v45 = vpack.c.bf16 %v1216_v43, %v1213_v33 }
 0x3f3   :  { %v3241_v46 = vpop.f32.mrb[24].mxu1 }
 0x3f4   :  { %v1229_v44 = vpop.f32.mrb[25].mxu1 }
 0x3f5   :  { %v3242_v47 = vpop.f32.mrb[26].mxu1 }
 0x3f6   :  { %v1329_v48 = vpack.c.bf16 %v3242_v47, %v3241_v46  ;;  %v1232_v49 = vpop.f32.mrb[27].mxu1 }
 0x3f7   :  { %v1328_v50 = vpack.c.bf16 %v1232_v49, %v1229_v44 }
 0x403   :  { %v3245_v51 = vpop.f32.mrb[28].mxu1 }
 0x404   :  { %v1245_v18 = vpop.f32.mrb[29].mxu1 }
 0x405   :  { %v3246_v52 = vpop.f32.mrb[30].mxu1 }
 0x406   :  { %v1331_v53 = vpack.c.bf16 %v3246_v52, %v3245_v51  ;;  %v1248_v54 = vpop.f32.mrb[31].mxu1 }
 0x407   :  { %v1330_v55 = vpack.c.bf16 %v1248_v54, %v1245_v18 }
 0x413   :  { %v3249_v56 = vpop.f32.mrb[32].mxu1 }
 0x414   :  { %v1261_v57 = vpop.f32.mrb[33].mxu1 }
 0x415   :  { %v3250_v58 = vpop.f32.mrb[34].mxu1 }
 0x416   :  { %v1333_v59 = vpack.c.bf16 %v3250_v58, %v3249_v56  ;;  %v1264_v60 = vpop.f32.mrb[35].mxu1 }
 0x417   :  { %v1332_v61 = vpack.c.bf16 %v1264_v60, %v1261_v57 }
 0x419   :  { %2735 = vmatprep.subr.bf16.mxu1 %v1332_v61 }
 0x41a   :  { %2736 = vmatpush3.bf16.msra.mxu1 %v1324_v28 }
 0x41b   :  { %2737 = vmatprep.subr.bf16.mxu1 %v1333_v59 }
 0x41e   :  { %2738 = vmatpush3.bf16.msra.mxu1 %v1325_v5 }
 0x423   :  { %v3253_v62 = vpop.f32.mrb[36].mxu1 }
 0x424   :  { %v1277_v63 = vpop.f32.mrb[37].mxu1 }
 0x425   :  { %v3254_v0 = vpop.f32.mrb[38].mxu1 }
 0x426   :  { %v1335_v1 = vpack.c.bf16 %v3254_v0, %v3253_v62  ;;  %v1280_v2 = vpop.f32.mrb[39].mxu1 }
 0x427   :  { %v1334_v3 = vpack.c.bf16 %v1280_v2, %v1277_v63 }
 0x429   :  { %2739 = vmatprep.subr.bf16.mxu1 %v1334_v3 }
 0x42a   :  { %2740 = vmatpush3.bf16.msra.mxu1 %v1326_v45  ;;  %v3464_v45 = vld [vmem:[%s4480_s8 + $0x8] sm:$0xff]  }
 0x42b   :  { %2741 = vmatprep.subr.bf16.mxu1 %v1335_v1 }
 0x42e   :  { %2742 = vmatpush3.bf16.msra.mxu1 %v1327_v37  ;;  %v3463_v37 = vld [vmem:[%s4480_s8] sm:$0xff]  }
 0x42f   :  { %3263 = vmatprep.subr.bf16.mxu0 %v3463_v37 }
 0x430   :  { %3264 = vmatpush3.bf16.msra.mxu0 %v3463_v37 }
 0x431   :  { %3265 = vmatprep.subr.bf16.mxu0 %v3464_v45 }
 0x433   :  { %v3257_v7 = vpop.f32.mrb[40].mxu1 }
 0x434   :  { %v1293_v31 = vpop.f32.mrb[41].mxu1  ;;  %3266 = vmatpush3.bf16.msra.mxu0 %v3464_v45 }
 0x435   :  { %v3258_v33 = vpop.f32.mrb[42].mxu1 }
 0x436   :  { %v1337_v36 = vpack.c.bf16 %v3258_v33, %v3257_v7  ;;  %v1296_v43 = vpop.f32.mrb[43].mxu1 }
 0x437   :  { %v1336_v46 = vpack.c.bf16 %v1296_v43, %v1293_v31 }
 0x439   :  { %2743 = vmatprep.subr.bf16.mxu1 %v1336_v46 }
 0x43a   :  { %2744 = vmatpush3.bf16.msra.mxu1 %v1328_v50 }
 0x43b   :  { %2745 = vmatprep.subr.bf16.mxu1 %v1337_v36 }
 0x43e   :  { %2746 = vmatpush3.bf16.msra.mxu1 %v1329_v48  ;;  %v3465_v48 = vld [vmem:[%s4480_s8 + $0x10] sm:$0xff]  }
 0x43f   :  { %3267 = vmatprep.subr.bf16.mxu0 %v3465_v48 }
 0x440   :  { %3268 = vmatpush3.bf16.msra.mxu0 %v3465_v48 }
 0x443   :  { %v3261_v5 = vpop.f32.mrb[44].mxu1 }
 0x444   :  { %v1309_v28 = vpop.f32.mrb[45].mxu1 }
 0x445   :  { %v3262_v44 = vpop.f32.mrb[46].mxu1 }
 0x446   :  { %v1339_v47 = vpack.c.bf16 %v3262_v44, %v3261_v5  ;;  %v1312_v49 = vpop.f32.mrb[47].mxu1 }
 0x447   :  { %v1338_v51 = vpack.c.bf16 %v1312_v49, %v1309_v28 }
 0x449   :  { %2747 = vmatprep.subr.bf16.mxu1 %v1338_v51 }
 0x44a   :  { %2748 = vmatpush3.bf16.msra.mxu1 %v1330_v55 }
 0x44b   :  { %2749 = vmatprep.subr.bf16.mxu1 %v1339_v47 }
 0x44e   :  { %2750 = vmatpush3.bf16.msra.mxu1 %v1331_v53 }
 0x451   :  { %1380 = vmatmul.mubr.bf16.vlgmr.msra.gmra.mrb[48].mxu1 %v3721_v4  ;;  %v3466_v4 = vld [vmem:[%s4480_s8 + $0x18] sm:$0xff]  }
 0x452   :  { %1387 = vmatprep.mubr.bf16.mxu1 %v3729_v6  ;;  %3269 = vmatprep.subr.bf16.mxu0 %v3466_v4  ;;  %v3467_v6 = vld [vmem:[%s4480_s8 + $0x20] sm:$0xff]  }
 0x453   :  { %3270 = vmatpush3.bf16.msra.mxu0 %v3466_v4 }
 0x454   :  { %3271 = vmatprep.subr.bf16.mxu0 %v3467_v6 }
 0x457   :  { %3272 = vmatpush3.bf16.msra.mxu0 %v3467_v6 }
 0x459   :  { %1388 = vmatmul.mubr.bf16.gmra.mrb[52].mxu1 %v3739_v8  ;;  %v3468_v8 = vld [vmem:[%s4480_s8 + $0x28] sm:$0xff]  }
 0x45a   :  { %1395 = vmatprep.mubr.bf16.mxu1 %v3744_v9  ;;  %3273 = vmatprep.subr.bf16.mxu0 %v3468_v8  ;;  %v3469_v9 = vld [vmem:[%s4480_s8 + $0x30] sm:$0xff]  }
 0x45b   :  { %3274 = vmatpush3.bf16.msra.mxu0 %v3468_v8 }
 0x45c   :  { %3275 = vmatprep.subr.bf16.mxu0 %v3469_v9 }
 0x45f   :  { %3276 = vmatpush3.bf16.msra.mxu0 %v3469_v9 }
 0x461   :  { %1396 = vmatmul.mubr.bf16.gmra.mrb[56].mxu1 %v3751_v10  ;;  %v3470_v10 = vld [vmem:[%s4480_s8 + $0x38] sm:$0xff]  }
 0x462   :  { %1403 = vmatprep.mubr.bf16.mxu1 %v3756_v11  ;;  %3277 = vmatprep.subr.bf16.mxu0 %v3470_v10 }
 0x463   :  { %3278 = vmatpush3.bf16.msra.mxu0 %v3470_v10 }
 0x469   :  { %1404 = vmatmul.mubr.bf16.gmra.mrb[60].mxu1 %v3763_v12  ;;  %v4021_v12 = vld [vmem:[%s4481_s7] ss:$0 sm:$0xff] }
 0x46a   :  { %1411 = vmatprep.mubr.bf16.mxu1 %v3768_v13 }
 0x471   :  { %1412 = vmatmul.mubr.bf16.gmra.mrb[64].mxu1 %v3775_v14 }
 0x472   :  { %1419 = vmatprep.mubr.bf16.mxu1 %v3780_v15 }
 0x479   :  { %1420 = vmatmul.mubr.bf16.gmra.mrb[68].mxu1 %v3787_v16 }
 0x47a   :  { %1427 = vmatprep.mubr.bf16.mxu1 %v3792_v17 }
 0x481   :  { %1428 = vmatmul.mubr.bf16.gmra.mrb[72].mxu1 %v3799_v19 }
 0x482   :  { %1435 = vmatprep.mubr.bf16.mxu1 %v3804_v20 }
 0x489   :  { %1436 = vmatmul.mubr.bf16.gmra.mrb[76].mxu1 %v3811_v21 }
 0x48a   :  { %1443 = vmatprep.mubr.bf16.mxu1 %v3816_v22 }
 0x491   :  { %1444 = vmatmul.mubr.bf16.gmra.mrb[80].mxu1 %v3823_v32 }
 0x492   :  { %1451 = vmatprep.mubr.bf16.mxu1 %v3828_v23 }
 0x499   :  { %1452 = vmatmul.mubr.bf16.gmra.mrb[84].mxu1 %v3835_v24 }
 0x49a   :  { %1459 = vmatprep.mubr.bf16.mxu1 %v3840_v25 }
 0x4a1   :  { %1460 = vmatmul.mubr.bf16.gmra.mrb[88].mxu1 %v3847_v26 }
 0x4a2   :  { %1467 = vmatprep.mubr.bf16.mxu1 %v3852_v27 }
 0x4a9   :  { %1468 = vmatmul.mubr.bf16.gmra.mrb[92].mxu1 %v3862_v29 }
 0x4aa   :  { %1475 = vmatprep.mubr.bf16.mxu1 %v3867_v30 }
 0x4b1   :  { %1476 = vmatmul.mubr.bf16.gmra.mrb[96].mxu1 %v3880_v34 }
 0x4b2   :  { %1483 = vmatprep.mubr.bf16.mxu1 %v3885_v35 }
 0x4b9   :  { %1484 = vmatmul.mubr.bf16.gmra.mrb[100].mxu1 %v3898_v38 }
 0x4ba   :  { %1491 = vmatprep.mubr.bf16.mxu1 %v3903_v39 }
 0x4c1   :  { %1492 = vmatmul.mubr.bf16.gmra.mrb[104].mxu1 %v3910_v40 }
 0x4c2   :  { %1499 = vmatprep.mubr.bf16.mxu1 %v3915_v41 }
 0x4c9   :  { %1500 = vmatmul.mubr.bf16.gmra.mrb[108].mxu1 %v3922_v42 }
 0x524   :  { %v2751_v11 = vpop.f32.mrb[48].mxu1 }
 0x525   :  { %v2752_v13 = vpop.f32.mrb[49].mxu1 }
 0x526   :  { %v2753_v14 = vadd.f32 %v2752_v13, %v2751_v11  ;;  %v2754_v15 = vpop.f32.mrb[50].mxu1 }
 0x527   :  { %v2755_v16 = vpop.f32.mrb[51].mxu1 }
 0x528   :  { %v1382_v17 = vadd.f32 %v2753_v14, %v4021_v12  ;;  %v2756_v19 = vadd.f32 %v2755_v16, %v2754_v15 }
 0x52a   :  { %v1385_v20 = vadd.f32 %v2756_v19, %v4021_v12  ;;  %v1508_v21 = vmax.f32 %v1382_v17, 0.0 }
 0x52c   :  { %v1509_v22 = vmax.f32 %v1385_v20, 0.0  ;;  %v2757_v32 = vpop.f32.mrb[52].mxu1 }
 0x52d   :  { %v2758_v23 = vpop.f32.mrb[53].mxu1 }
 0x52e   :  { %v2759_v24 = vadd.f32 %v2758_v23, %v2757_v32  ;;  %v2760_v25 = vpop.f32.mrb[54].mxu1  ;;  %v1540_v26 = vpack.c.bf16 %v1509_v22, %v1508_v21 }
 0x52f   :  { %v2761_v27 = vpop.f32.mrb[55].mxu1 }
 0x530   :  { %v1390_v29 = vadd.f32 %v2759_v24, %v4021_v12  ;;  %v2762_v30 = vadd.f32 %v2761_v27, %v2760_v25  ;;  %3279 = vmatprep.mubr.bf16.mxu0 %v1540_v26 }
 0x532   :  { %v1393_v34 = vadd.f32 %v2762_v30, %v4021_v12  ;;  %v1510_v35 = vmax.f32 %v1390_v29, 0.0 }
 0x534   :  { %v1511_v38 = vmax.f32 %v1393_v34, 0.0  ;;  %v2763_v39 = vpop.f32.mrb[56].mxu1 }
 0x535   :  { %v2764_v40 = vpop.f32.mrb[57].mxu1 }
 0x536   :  { %v1541_v41 = vpack.c.bf16 %v1511_v38, %v1510_v35  ;;  %v2765_v42 = vadd.f32 %v2764_v40, %v2763_v39  ;;  %v2766_v50 = vpop.f32.mrb[58].mxu1 }
 0x537   :  { %v2767_v18 = vpop.f32.mrb[59].mxu1 }
 0x538   :  { %v1398_v52 = vadd.f32 %v2765_v42, %v4021_v12  ;;  %v2768_v53 = vadd.f32 %v2767_v18, %v2766_v50  ;;  %3280 = vmatmul.mubr.bf16.vlgmr.msra.gmra.mrb[112].mxu0 %v1541_v41 }
 0x53a   :  { %v1401_v54 = vadd.f32 %v2768_v53, %v4021_v12  ;;  %v1512_v55 = vmax.f32 %v1398_v52, 0.0 }
 0x53c   :  { %v1513_v56 = vmax.f32 %v1401_v54, 0.0  ;;  %v2769_v57 = vpop.f32.mrb[60].mxu1 }
 0x53d   :  { %v2770_v58 = vpop.f32.mrb[61].mxu1 }
 0x53e   :  { %v2771_v59 = vadd.f32 %v2770_v58, %v2769_v57  ;;  %v2772_v60 = vpop.f32.mrb[62].mxu1  ;;  %v1542_v61 = vpack.c.bf16 %v1513_v56, %v1512_v55 }
 0x53f   :  { %v2773_v62 = vpop.f32.mrb[63].mxu1 }
 0x540   :  { %v1406_v63 = vadd.f32 %v2771_v59, %v4021_v12  ;;  %v2774_v0 = vadd.f32 %v2773_v62, %v2772_v60  ;;  %3283 = vmatprep.mubr.bf16.mxu0 %v1542_v61 }
 0x542   :  { %v1409_v1 = vadd.f32 %v2774_v0, %v4021_v12  ;;  %v1514_v2 = vmax.f32 %v1406_v63, 0.0 }
 0x544   :  { %v1515_v3 = vmax.f32 %v1409_v1, 0.0  ;;  %v2775_v7 = vpop.f32.mrb[64].mxu1 }
 0x545   :  { %v2776_v31 = vpop.f32.mrb[65].mxu1 }
 0x546   :  { %v2777_v33 = vadd.f32 %v2776_v31, %v2775_v7  ;;  %v2778_v36 = vpop.f32.mrb[66].mxu1  ;;  %v1543_v43 = vpack.c.bf16 %v1515_v3, %v1514_v2 }
 0x547   :  { %v2779_v46 = vpop.f32.mrb[67].mxu1 }
 0x548   :  { %v1414_v5 = vadd.f32 %v2777_v33, %v4021_v12  ;;  %v2780_v28 = vadd.f32 %v2779_v46, %v2778_v36  ;;  %3284 = vmatmul.mubr.bf16.gmra.mrb[116].mxu0 %v1543_v43 }
 0x54a   :  { %v1417_v44 = vadd.f32 %v2780_v28, %v4021_v12  ;;  %v1516_v47 = vmax.f32 %v1414_v5, 0.0 }
 0x54c   :  { %v1517_v49 = vmax.f32 %v1417_v44, 0.0  ;;  %v2781_v51 = vpop.f32.mrb[68].mxu1 }
 0x54d   :  { %v2782_v37 = vpop.f32.mrb[69].mxu1 }
 0x54e   :  { %v2783_v45 = vadd.f32 %v2782_v37, %v2781_v51  ;;  %v2784_v48 = vpop.f32.mrb[70].mxu1  ;;  %v1544_v4 = vpack.c.bf16 %v1517_v49, %v1516_v47 }
 0x54f   :  { %v2785_v6 = vpop.f32.mrb[71].mxu1 }
 0x550   :  { %v1422_v8 = vadd.f32 %v2783_v45, %v4021_v12  ;;  %v2786_v9 = vadd.f32 %v2785_v6, %v2784_v48  ;;  %3287 = vmatprep.mubr.bf16.mxu0 %v1544_v4 }
 0x552   :  { %v1425_v10 = vadd.f32 %v2786_v9, %v4021_v12  ;;  %v1518_v11 = vmax.f32 %v1422_v8, 0.0 }
 0x554   :  { %v1519_v13 = vmax.f32 %v1425_v10, 0.0  ;;  %v2787_v14 = vpop.f32.mrb[72].mxu1 }
 0x555   :  { %v2788_v15 = vpop.f32.mrb[73].mxu1 }
 0x556   :  { %v2789_v16 = vadd.f32 %v2788_v15, %v2787_v14  ;;  %v2790_v17 = vpop.f32.mrb[74].mxu1  ;;  %v1545_v19 = vpack.c.bf16 %v1519_v13, %v1518_v11 }
 0x557   :  { %v2791_v20 = vpop.f32.mrb[75].mxu1 }
 0x558   :  { %v1430_v21 = vadd.f32 %v2789_v16, %v4021_v12  ;;  %v2792_v22 = vadd.f32 %v2791_v20, %v2790_v17  ;;  %3288 = vmatmul.mubr.bf16.gmra.mrb[120].mxu0 %v1545_v19 }
 0x55a   :  { %v1433_v32 = vadd.f32 %v2792_v22, %v4021_v12  ;;  %v1520_v23 = vmax.f32 %v1430_v21, 0.0 }
 0x55c   :  { %v1521_v24 = vmax.f32 %v1433_v32, 0.0  ;;  %v2793_v25 = vpop.f32.mrb[76].mxu1 }
 0x55d   :  { %v2794_v26 = vpop.f32.mrb[77].mxu1 }
 0x55e   :  { %v2795_v27 = vadd.f32 %v2794_v26, %v2793_v25  ;;  %v2796_v29 = vpop.f32.mrb[78].mxu1  ;;  %v1546_v30 = vpack.c.bf16 %v1521_v24, %v1520_v23 }
 0x55f   :  { %v2797_v34 = vpop.f32.mrb[79].mxu1 }
 0x560   :  { %v1438_v35 = vadd.f32 %v2795_v27, %v4021_v12  ;;  %v2798_v38 = vadd.f32 %v2797_v34, %v2796_v29  ;;  %3291 = vmatprep.mubr.bf16.mxu0 %v1546_v30 }
 0x562   :  { %v1441_v39 = vadd.f32 %v2798_v38, %v4021_v12  ;;  %v1522_v40 = vmax.f32 %v1438_v35, 0.0 }
 0x564   :  { %v1523_v41 = vmax.f32 %v1441_v39, 0.0  ;;  %v2799_v42 = vpop.f32.mrb[80].mxu1 }
 0x565   :  { %v2800_v50 = vpop.f32.mrb[81].mxu1 }
 0x566   :  { %v2801_v18 = vadd.f32 %v2800_v50, %v2799_v42  ;;  %v2802_v52 = vpop.f32.mrb[82].mxu1  ;;  %v1547_v53 = vpack.c.bf16 %v1523_v41, %v1522_v40 }
 0x567   :  { %v2803_v54 = vpop.f32.mrb[83].mxu1 }
 0x568   :  { %v1446_v55 = vadd.f32 %v2801_v18, %v4021_v12  ;;  %v2804_v56 = vadd.f32 %v2803_v54, %v2802_v52  ;;  %3292 = vmatmul.mubr.bf16.gmra.mrb[124].mxu0 %v1547_v53 }
 0x56a   :  { %v1449_v57 = vadd.f32 %v2804_v56, %v4021_v12  ;;  %v1524_v58 = vmax.f32 %v1446_v55, 0.0 }
 0x56c   :  { %v1525_v59 = vmax.f32 %v1449_v57, 0.0  ;;  %v2805_v60 = vpop.f32.mrb[84].mxu1 }
 0x56d   :  { %v2806_v61 = vpop.f32.mrb[85].mxu1 }
 0x56e   :  { %v2807_v62 = vadd.f32 %v2806_v61, %v2805_v60  ;;  %v2808_v63 = vpop.f32.mrb[86].mxu1  ;;  %v1548_v0 = vpack.c.bf16 %v1525_v59, %v1524_v58 }
 0x56f   :  { %v2809_v1 = vpop.f32.mrb[87].mxu1 }
 0x570   :  { %v1454_v2 = vadd.f32 %v2807_v62, %v4021_v12  ;;  %v2810_v3 = vadd.f32 %v2809_v1, %v2808_v63  ;;  %3295 = vmatprep.mubr.bf16.mxu0 %v1548_v0 }
 0x572   :  { %v1457_v7 = vadd.f32 %v2810_v3, %v4021_v12  ;;  %v1526_v31 = vmax.f32 %v1454_v2, 0.0 }
 0x574   :  { %v1527_v33 = vmax.f32 %v1457_v7, 0.0  ;;  %v2811_v36 = vpop.f32.mrb[88].mxu1 }
 0x575   :  { %v2812_v43 = vpop.f32.mrb[89].mxu1 }
 0x576   :  { %v2813_v46 = vadd.f32 %v2812_v43, %v2811_v36  ;;  %v2814_v5 = vpop.f32.mrb[90].mxu1  ;;  %v1549_v28 = vpack.c.bf16 %v1527_v33, %v1526_v31 }
 0x577   :  { %v2815_v44 = vpop.f32.mrb[91].mxu1 }
 0x578   :  { %v1462_v47 = vadd.f32 %v2813_v46, %v4021_v12  ;;  %v2816_v49 = vadd.f32 %v2815_v44, %v2814_v5  ;;  %3296 = vmatmul.mubr.bf16.gmra.mrb[128].mxu0 %v1549_v28  ;;  %v4058_v28 = vld [vmem:[%s4477_s0 + $0x4] ss:$8 sps:$4 sm:$0xff]  }
 0x57a   :  { %v1465_v51 = vadd.f32 %v2816_v49, %v4021_v12  ;;  %v1528_v37 = vmax.f32 %v1462_v47, 0.0 }
 0x57c   :  { %v1529_v45 = vmax.f32 %v1465_v51, 0.0  ;;  %v2817_v48 = vpop.f32.mrb[92].mxu1 }
 0x57d   :  { %v2818_v4 = vpop.f32.mrb[93].mxu1 }
 0x57e   :  { %v2819_v6 = vadd.f32 %v2818_v4, %v2817_v48  ;;  %v2820_v8 = vpop.f32.mrb[94].mxu1  ;;  %v1550_v9 = vpack.c.bf16 %v1529_v45, %v1528_v37 }
 0x57f   :  { %v2821_v10 = vpop.f32.mrb[95].mxu1 }
 0x580   :  { %v1470_v11 = vadd.f32 %v2819_v6, %v4021_v12  ;;  %v2822_v13 = vadd.f32 %v2821_v10, %v2820_v8  ;;  %3299 = vmatprep.mubr.bf16.mxu0 %v1550_v9 }
 0x582   :  { %v1473_v14 = vadd.f32 %v2822_v13, %v4021_v12  ;;  %v1530_v15 = vmax.f32 %v1470_v11, 0.0 }
 0x584   :  { %v1531_v16 = vmax.f32 %v1473_v14, 0.0  ;;  %v2823_v17 = vpop.f32.mrb[96].mxu1 }
 0x585   :  { %v2824_v19 = vpop.f32.mrb[97].mxu1 }
 0x586   :  { %v2825_v20 = vadd.f32 %v2824_v19, %v2823_v17  ;;  %v2826_v21 = vpop.f32.mrb[98].mxu1  ;;  %v1551_v22 = vpack.c.bf16 %v1531_v16, %v1530_v15 }
 0x587   :  { %v2827_v32 = vpop.f32.mrb[99].mxu1 }
 0x588   :  { %v1478_v23 = vadd.f32 %v2825_v20, %v4021_v12  ;;  %v2828_v24 = vadd.f32 %v2827_v32, %v2826_v21  ;;  %3300 = vmatmul.mubr.bf16.gmra.mrb[132].mxu0 %v1551_v22 }
 0x58a   :  { %v1481_v25 = vadd.f32 %v2828_v24, %v4021_v12  ;;  %v1532_v26 = vmax.f32 %v1478_v23, 0.0 }
 0x58c   :  { %v1533_v27 = vmax.f32 %v1481_v25, 0.0  ;;  %v2829_v29 = vpop.f32.mrb[100].mxu1 }
 0x58d   :  { %v2830_v30 = vpop.f32.mrb[101].mxu1 }
 0x58e   :  { %v2831_v34 = vadd.f32 %v2830_v30, %v2829_v29  ;;  %v2832_v35 = vpop.f32.mrb[102].mxu1  ;;  %v1552_v38 = vpack.c.bf16 %v1533_v27, %v1532_v26 }
 0x58f   :  { %v2833_v39 = vpop.f32.mrb[103].mxu1 }
 0x590   :  { %v1486_v40 = vadd.f32 %v2831_v34, %v4021_v12  ;;  %v2834_v41 = vadd.f32 %v2833_v39, %v2832_v35  ;;  %3303 = vmatprep.mubr.bf16.mxu0 %v1552_v38 }
 0x592   :  { %v1489_v42 = vadd.f32 %v2834_v41, %v4021_v12  ;;  %v1534_v50 = vmax.f32 %v1486_v40, 0.0 }
 0x594   :  { %v1535_v18 = vmax.f32 %v1489_v42, 0.0  ;;  %v2835_v52 = vpop.f32.mrb[104].mxu1 }
 0x595   :  { %v2836_v53 = vpop.f32.mrb[105].mxu1 }
 0x596   :  { %v2837_v54 = vadd.f32 %v2836_v53, %v2835_v52  ;;  %v2838_v55 = vpop.f32.mrb[106].mxu1  ;;  %v1553_v56 = vpack.c.bf16 %v1535_v18, %v1534_v50 }
 0x597   :  { %v2839_v57 = vpop.f32.mrb[107].mxu1 }
 0x598   :  { %v1494_v58 = vadd.f32 %v2837_v54, %v4021_v12  ;;  %v2840_v59 = vadd.f32 %v2839_v57, %v2838_v55  ;;  %3304 = vmatmul.mubr.bf16.gmra.mrb[136].mxu0 %v1553_v56 }
 0x59a   :  { %v1497_v60 = vadd.f32 %v2840_v59, %v4021_v12  ;;  %v1536_v61 = vmax.f32 %v1494_v58, 0.0 }
 0x59c   :  { %v1537_v62 = vmax.f32 %v1497_v60, 0.0  ;;  %v2841_v63 = vpop.f32.mrb[108].mxu1  ;;  %v3471_v60 = vld [vmem:[%s4482_s10] sm:$0xff]  }
 0x59d   :  { %v2842_v0 = vpop.f32.mrb[109].mxu1  ;;  %3311 = vmatprep.subr.bf16.mxu1 %v3471_v60 }
 0x59e   :  { %v2843_v1 = vadd.f32 %v2842_v0, %v2841_v63  ;;  %v2844_v2 = vpop.f32.mrb[110].mxu1  ;;  %v1554_v3 = vpack.c.bf16 %v1537_v62, %v1536_v61  ;;  %v3472_v61 = vld [vmem:[%s4482_s10 + $0x8] sm:$0xff]   ;;  %v3473_v62 = vld [vmem:[%s4482_s10 + $0x10] sm:$0xff]   ;;  %3312 = vmatpush3.bf16.msra.mxu1 %v3471_v60 }
 0x59f   :  { %v2845_v7 = vpop.f32.mrb[111].mxu1  ;;  %3313 = vmatprep.subr.bf16.mxu1 %v3472_v61  ;;  %v4073_v63 = vld [vmem:[%s4477_s0] ss:$8 sps:$4 sm:$0xff]   ;;  %v4079_v0 = vld [vmem:[%s4477_s0 + $0x14] ss:$8 sps:$4 sm:$0xff]  }
 0x5a0   :  { %v1502_v31 = vadd.f32 %v2843_v1, %v4021_v12  ;;  %v2846_v33 = vadd.f32 %v2845_v7, %v2844_v2  ;;  %3307 = vmatprep.mubr.bf16.mxu0 %v1554_v3  ;;  %v4085_v1 = vld [vmem:[%s4477_s0 + $0x10] ss:$8 sps:$4 sm:$0xff]   ;;  %v4091_v2 = vld [vmem:[%s4477_s0 + $0x24] ss:$8 sps:$4 sm:$0xff]   ;;  %v4097_v3 = vld [vmem:[%s4477_s0 + $0x20] ss:$8 sps:$4 sm:$0xff]  }
 0x5a1   :  { %v4103_v7 = vld [vmem:[%s4477_s0 + $0x34] ss:$8 sps:$4 sm:$0xff]  }
 0x5a2   :  { %v1505_v36 = vadd.f32 %v2846_v33, %v4021_v12  ;;  %v1538_v43 = vmax.f32 %v1502_v31, 0.0  ;;  %3314 = vmatpush3.bf16.msra.mxu1 %v3472_v61  ;;  %v4109_v31 = vld [vmem:[%s4477_s0 + $0x30] ss:$8 sps:$4 sm:$0xff]   ;;  %v4115_v33 = vld [vmem:[%s4477_s0 + $0x44] ss:$8 sps:$4 sm:$0xff]  }
 0x5a3   :  { %3315 = vmatprep.subr.bf16.mxu1 %v3473_v62 }
 0x5a4   :  { %v1539_v46 = vmax.f32 %v1505_v36, 0.0  ;;  %v4121_v36 = vld [vmem:[%s4477_s0 + $0x40] ss:$8 sps:$4 sm:$0xff]  }
 0x5a6   :  { %v1555_v5 = vpack.c.bf16 %v1539_v46, %v1538_v43  ;;  %3316 = vmatpush3.bf16.msra.mxu1 %v3473_v62  ;;  %v4127_v43 = vld [vmem:[%s4477_s0 + $0x54] ss:$8 sps:$4 sm:$0xff]   ;;  %v4133_v46 = vld [vmem:[%s4477_s0 + $0x50] ss:$8 sps:$4 sm:$0xff]  }
 0x5a8   :  { %3308 = vmatmul.mubr.bf16.gmra.mrb[140].mxu0 %v1555_v5  ;;  %v4139_v5 = vld [vmem:[%s4477_s0 + $0x64] ss:$8 sps:$4 sm:$0xff]  }
 0x5a9   :  { %1836 = vmatprep.mubr.bf16.mxu0 %v4058_v28 }
 0x60b   :  { %v3281_v44 = vpop.f32.mrb[112].mxu0 }
 0x60c   :  { %v1654_v47 = vpop.f32.mrb[113].mxu0 }
 0x60d   :  { %v3282_v49 = vpop.f32.mrb[114].mxu0 }
 0x60e   :  { %v1782_v51 = vpack.c.bf16 %v3282_v49, %v3281_v44  ;;  %v1657_v37 = vpop.f32.mrb[115].mxu0  ;;  %v4145_v44 = vld [vmem:[%s4477_s0 + $0x60] ss:$8 sps:$4 sm:$0xff]   ;;  %v4157_v49 = vld [vmem:[%s4477_s0 + $0x70] ss:$8 sps:$4 sm:$0xff]  }
 0x60f   :  { %v1781_v45 = vpack.c.bf16 %v1657_v37, %v1654_v47  ;;  %v4151_v47 = vld [vmem:[%s4477_s0 + $0x74] ss:$8 sps:$4 sm:$0xff]   ;;  %v4169_v37 = vld [vmem:[%s4477_s0 + $0x80] ss:$8 sps:$4 sm:$0xff]  }
 0x61b   :  { %v3285_v48 = vpop.f32.mrb[116].mxu0 }
 0x61c   :  { %v1670_v4 = vpop.f32.mrb[117].mxu0 }
 0x61d   :  { %v3286_v12 = vpop.f32.mrb[118].mxu0 }
 0x61e   :  { %v1784_v6 = vpack.c.bf16 %v3286_v12, %v3285_v48  ;;  %v1673_v8 = vpop.f32.mrb[119].mxu0  ;;  %v4181_v48 = vld [vmem:[%s4477_s0 + $0x90] ss:$8 sps:$4 sm:$0xff]   ;;  %v4193_v12 = vld [vmem:[%s4477_s0 + $0xa0] ss:$8 sps:$4 sm:$0xff]  }
 0x61f   :  { %v1783_v9 = vpack.c.bf16 %v1673_v8, %v1670_v4  ;;  %v4187_v4 = vld [vmem:[%s4477_s0 + $0xa4] ss:$8 sps:$4 sm:$0xff]   ;;  %v3474_v8 = vld [vmem:[%s4482_s10 + $0x18] sm:$0xff]  }
 0x620   :  { %3317 = vmatprep.subr.bf16.mxu1 %v3474_v8 }
 0x621   :  { %3318 = vmatpush3.bf16.msra.mxu1 %v3474_v8 }
 0x62b   :  { %v3289_v10 = vpop.f32.mrb[120].mxu0 }
 0x62c   :  { %v1686_v11 = vpop.f32.mrb[121].mxu0 }
 0x62d   :  { %v3290_v13 = vpop.f32.mrb[122].mxu0 }
 0x62e   :  { %v1786_v14 = vpack.c.bf16 %v3290_v13, %v3289_v10  ;;  %v1689_v15 = vpop.f32.mrb[123].mxu0  ;;  %v4211_v10 = vld [vmem:[%s4477_s0 + $0xb0] ss:$8 sps:$4 sm:$0xff]   ;;  %v3476_v13 = vld [vmem:[%s4482_s10 + $0x28] sm:$0xff]  }
 0x62f   :  { %v1785_v16 = vpack.c.bf16 %v1689_v15, %v1686_v11  ;;  %v4217_v11 = vld [vmem:[%s4477_s0 + $0xc4] ss:$8 sps:$4 sm:$0xff]   ;;  %v4229_v15 = vld [vmem:[%s4477_s0 + $0xc0] ss:$8 sps:$4 sm:$0xff]  }
 0x63b   :  { %v3293_v17 = vpop.f32.mrb[124].mxu0 }
 0x63c   :  { %v1702_v19 = vpop.f32.mrb[125].mxu0 }
 0x63d   :  { %v3294_v20 = vpop.f32.mrb[126].mxu0 }
 0x63e   :  { %v1788_v21 = vpack.c.bf16 %v3294_v20, %v3293_v17  ;;  %v1705_v22 = vpop.f32.mrb[127].mxu0  ;;  %v3478_v17 = vld [vmem:[%s4482_s10 + $0x38] sm:$0xff]   ;;  %v4250_v20 = vld [vmem:[%s4477_s0 + $0xe4] ss:$8 sps:$4 sm:$0xff]  }
 0x63f   :  { %v1787_v32 = vpack.c.bf16 %v1705_v22, %v1702_v19  ;;  %v4244_v19 = vld [vmem:[%s4477_s0 + $0xd0] ss:$8 sps:$4 sm:$0xff]   ;;  %v4262_v22 = vld [vmem:[%s4477_s0 + $0xf4] ss:$8 sps:$4 sm:$0xff]  }
 0x64b   :  { %v3297_v23 = vpop.f32.mrb[128].mxu0 }
 0x64c   :  { %v1718_v24 = vpop.f32.mrb[129].mxu0 }
 0x64d   :  { %v3298_v25 = vpop.f32.mrb[130].mxu0 }
 0x64e   :  { %v1790_v26 = vpack.c.bf16 %v3298_v25, %v3297_v23  ;;  %v1721_v27 = vpop.f32.mrb[131].mxu0 }
 0x64f   :  { %v1789_v29 = vpack.c.bf16 %v1721_v27, %v1718_v24  ;;  %v4274_v24 = vld [vmem:[%s4483_s9] ss:$0 sm:$0xff] }
 0x651   :  { %2871 = vmatprep.subr.bf16.mxu0 %v1789_v29 }
 0x652   :  { %2872 = vmatpush3.bf16.msra.mxu0 %v1781_v45  ;;  %v4175_v45 = vld [vmem:[%s4477_s0 + $0x94] ss:$8 sps:$4 sm:$0xff]  }
 0x653   :  { %2873 = vmatprep.subr.bf16.mxu0 %v1790_v26 }
 0x656   :  { %2874 = vmatpush3.bf16.msra.mxu0 %v1782_v51  ;;  %v4163_v51 = vld [vmem:[%s4477_s0 + $0x84] ss:$8 sps:$4 sm:$0xff]  }
 0x65b   :  { %v3301_v30 = vpop.f32.mrb[132].mxu0 }
 0x65c   :  { %v1734_v34 = vpop.f32.mrb[133].mxu0 }
 0x65d   :  { %v3302_v35 = vpop.f32.mrb[134].mxu0 }
 0x65e   :  { %v1792_v38 = vpack.c.bf16 %v3302_v35, %v3301_v30  ;;  %v1737_v39 = vpop.f32.mrb[135].mxu0 }
 0x65f   :  { %v1791_v40 = vpack.c.bf16 %v1737_v39, %v1734_v34 }
 0x661   :  { %2875 = vmatprep.subr.bf16.mxu0 %v1791_v40 }
 0x662   :  { %2876 = vmatpush3.bf16.msra.mxu0 %v1783_v9  ;;  %v3475_v9 = vld [vmem:[%s4482_s10 + $0x20] sm:$0xff]  }
 0x663   :  { %2877 = vmatprep.subr.bf16.mxu0 %v1792_v38  ;;  %3319 = vmatprep.subr.bf16.mxu1 %v3475_v9 }
 0x664   :  { %3320 = vmatpush3.bf16.msra.mxu1 %v3475_v9 }
 0x665   :  { %3321 = vmatprep.subr.bf16.mxu1 %v3476_v13 }
 0x666   :  { %2878 = vmatpush3.bf16.msra.mxu0 %v1784_v6  ;;  %v4199_v6 = vld [vmem:[%s4477_s0 + $0xb4] ss:$8 sps:$4 sm:$0xff]  }
 0x668   :  { %3322 = vmatpush3.bf16.msra.mxu1 %v3476_v13 }
 0x66b   :  { %v3305_v41 = vpop.f32.mrb[136].mxu0 }
 0x66c   :  { %v1750_v42 = vpop.f32.mrb[137].mxu0 }
 0x66d   :  { %v3306_v50 = vpop.f32.mrb[138].mxu0 }
 0x66e   :  { %v1794_v18 = vpack.c.bf16 %v3306_v50, %v3305_v41  ;;  %v1753_v52 = vpop.f32.mrb[139].mxu0 }
 0x66f   :  { %v1793_v53 = vpack.c.bf16 %v1753_v52, %v1750_v42 }
 0x671   :  { %2879 = vmatprep.subr.bf16.mxu0 %v1793_v53 }
 0x672   :  { %2880 = vmatpush3.bf16.msra.mxu0 %v1785_v16  ;;  %v4235_v16 = vld [vmem:[%s4477_s0 + $0xd4] ss:$8 sps:$4 sm:$0xff]  }
 0x673   :  { %2881 = vmatprep.subr.bf16.mxu0 %v1794_v18 }
 0x676   :  { %2882 = vmatpush3.bf16.msra.mxu0 %v1786_v14  ;;  %v3477_v14 = vld [vmem:[%s4482_s10 + $0x30] sm:$0xff]  }
 0x677   :  { %3323 = vmatprep.subr.bf16.mxu1 %v3477_v14 }
 0x678   :  { %3324 = vmatpush3.bf16.msra.mxu1 %v3477_v14 }
 0x679   :  { %3325 = vmatprep.subr.bf16.mxu1 %v3478_v17 }
 0x67b   :  { %v3309_v54 = vpop.f32.mrb[140].mxu0 }
 0x67c   :  { %v1766_v55 = vpop.f32.mrb[141].mxu0  ;;  %3326 = vmatpush3.bf16.msra.mxu1 %v3478_v17 }
 0x67d   :  { %v3310_v56 = vpop.f32.mrb[142].mxu0 }
 0x67e   :  { %v1796_v57 = vpack.c.bf16 %v3310_v56, %v3309_v54  ;;  %v1769_v58 = vpop.f32.mrb[143].mxu0 }
 0x67f   :  { %v1795_v59 = vpack.c.bf16 %v1769_v58, %v1766_v55 }
 0x681   :  { %2883 = vmatprep.subr.bf16.mxu0 %v1795_v59 }
 0x682   :  { %2884 = vmatpush3.bf16.msra.mxu0 %v1787_v32  ;;  %v4268_v32 = vld [vmem:[%s4477_s0 + $0xf0] ss:$8 sps:$4 sm:$0xff]  }
 0x683   :  { %2885 = vmatprep.subr.bf16.mxu0 %v1796_v57 }
 0x686   :  { %2886 = vmatpush3.bf16.msra.mxu0 %v1788_v21  ;;  %v4256_v21 = vld [vmem:[%s4477_s0 + $0xe0] ss:$8 sps:$4 sm:$0xff]  }
 0x689   :  { %1837 = vmatmul.mubr.bf16.vlgmr.msra.gmra.mrb[144].mxu0 %v4073_v63 }
 0x68a   :  { %1844 = vmatprep.mubr.bf16.mxu0 %v4079_v0 }
 0x691   :  { %1845 = vmatmul.mubr.bf16.gmra.mrb[148].mxu0 %v4085_v1 }
 0x692   :  { %1852 = vmatprep.mubr.bf16.mxu0 %v4091_v2 }
 0x699   :  { %1853 = vmatmul.mubr.bf16.gmra.mrb[152].mxu0 %v4097_v3 }
 0x69a   :  { %1860 = vmatprep.mubr.bf16.mxu0 %v4103_v7 }
 0x6a1   :  { %1861 = vmatmul.mubr.bf16.gmra.mrb[156].mxu0 %v4109_v31 }
 0x6a2   :  { %1868 = vmatprep.mubr.bf16.mxu0 %v4115_v33 }
 0x6a9   :  { %1869 = vmatmul.mubr.bf16.gmra.mrb[160].mxu0 %v4121_v36 }
 0x6aa   :  { %1876 = vmatprep.mubr.bf16.mxu0 %v4127_v43 }
 0x6b1   :  { %1877 = vmatmul.mubr.bf16.gmra.mrb[164].mxu0 %v4133_v46 }
 0x6b2   :  { %1884 = vmatprep.mubr.bf16.mxu0 %v4139_v5 }
 0x6b9   :  { %1885 = vmatmul.mubr.bf16.gmra.mrb[168].mxu0 %v4145_v44 }
 0x6ba   :  { %1892 = vmatprep.mubr.bf16.mxu0 %v4151_v47 }
 0x6c1   :  { %1893 = vmatmul.mubr.bf16.gmra.mrb[172].mxu0 %v4157_v49 }
 0x6c2   :  { %1900 = vmatprep.mubr.bf16.mxu0 %v4163_v51 }
 0x6c9   :  { %1901 = vmatmul.mubr.bf16.gmra.mrb[176].mxu0 %v4169_v37 }
 0x6ca   :  { %1908 = vmatprep.mubr.bf16.mxu0 %v4175_v45 }
 0x6d1   :  { %1909 = vmatmul.mubr.bf16.gmra.mrb[180].mxu0 %v4181_v48 }
 0x6d2   :  { %1916 = vmatprep.mubr.bf16.mxu0 %v4187_v4 }
 0x6d9   :  { %1917 = vmatmul.mubr.bf16.gmra.mrb[184].mxu0 %v4193_v12 }
 0x6da   :  { %1924 = vmatprep.mubr.bf16.mxu0 %v4199_v6 }
 0x6e1   :  { %1925 = vmatmul.mubr.bf16.gmra.mrb[188].mxu0 %v4211_v10 }
 0x6e2   :  { %1932 = vmatprep.mubr.bf16.mxu0 %v4217_v11 }
 0x6e9   :  { %1933 = vmatmul.mubr.bf16.gmra.mrb[192].mxu0 %v4229_v15 }
 0x6ea   :  { %1940 = vmatprep.mubr.bf16.mxu0 %v4235_v16 }
 0x6f1   :  { %1941 = vmatmul.mubr.bf16.gmra.mrb[196].mxu0 %v4244_v19 }
 0x6f2   :  { %1948 = vmatprep.mubr.bf16.mxu0 %v4250_v20 }
 0x6f9   :  { %1949 = vmatmul.mubr.bf16.gmra.mrb[200].mxu0 %v4256_v21 }
 0x6fa   :  { %1956 = vmatprep.mubr.bf16.mxu0 %v4262_v22 }
 0x701   :  { %1957 = vmatmul.mubr.bf16.gmra.mrb[204].mxu0 %v4268_v32 }
 0x75c   :  { %v2887_v23 = vpop.f32.mrb[144].mxu0 }
 0x75d   :  { %v2888_v25 = vpop.f32.mrb[145].mxu0 }
 0x75e   :  { %v2889_v26 = vadd.f32 %v2888_v25, %v2887_v23  ;;  %v2890_v27 = vpop.f32.mrb[146].mxu0 }
 0x75f   :  { %v2891_v29 = vpop.f32.mrb[147].mxu0 }
 0x760   :  { %v1839_v30 = vadd.f32 %v2889_v26, %v4274_v24  ;;  %v2892_v34 = vadd.f32 %v2891_v29, %v2890_v27 }
 0x762   :  { %v1842_v35 = vadd.f32 %v2892_v34, %v4274_v24  ;;  %v1965_v38 = vmax.f32 %v1839_v30, 0.0 }
 0x764   :  { %v1966_v39 = vmax.f32 %v1842_v35, 0.0  ;;  %v2893_v40 = vpop.f32.mrb[148].mxu0 }
 0x765   :  { %v2894_v41 = vpop.f32.mrb[149].mxu0 }
 0x766   :  { %v2895_v42 = vadd.f32 %v2894_v41, %v2893_v40  ;;  %v2896_v50 = vpop.f32.mrb[150].mxu0  ;;  %v1997_v18 = vpack.c.bf16 %v1966_v39, %v1965_v38 }
 0x767   :  { %v2897_v52 = vpop.f32.mrb[151].mxu0 }
 0x768   :  { %v1847_v53 = vadd.f32 %v2895_v42, %v4274_v24  ;;  %v2898_v54 = vadd.f32 %v2897_v52, %v2896_v50  ;;  %3327 = vmatprep.mubr.bf16.mxu1 %v1997_v18 }
 0x76a   :  { %v1850_v55 = vadd.f32 %v2898_v54, %v4274_v24  ;;  %v1967_v56 = vmax.f32 %v1847_v53, 0.0 }
 0x76c   :  { %v1968_v57 = vmax.f32 %v1850_v55, 0.0  ;;  %v2899_v58 = vpop.f32.mrb[152].mxu0 }
 0x76d   :  { %v2900_v59 = vpop.f32.mrb[153].mxu0 }
 0x76e   :  { %v1998_v60 = vpack.c.bf16 %v1968_v57, %v1967_v56  ;;  %v2901_v61 = vadd.f32 %v2900_v59, %v2899_v58  ;;  %v2902_v62 = vpop.f32.mrb[154].mxu0 }
 0x76f   :  { %v2903_v8 = vpop.f32.mrb[155].mxu0 }
 0x770   :  { %v1855_v9 = vadd.f32 %v2901_v61, %v4274_v24  ;;  %v2904_v13 = vadd.f32 %v2903_v8, %v2902_v62  ;;  %3328 = vmatmul.mubr.bf16.vlgmr.msra.gmra.mrb[112].mxu1 %v1998_v60 }
 0x772   :  { %v1858_v14 = vadd.f32 %v2904_v13, %v4274_v24  ;;  %v1969_v17 = vmax.f32 %v1855_v9, 0.0 }
 0x774   :  { %v1970_v23 = vmax.f32 %v1858_v14, 0.0  ;;  %v2905_v25 = vpop.f32.mrb[156].mxu0 }
 0x775   :  { %v2906_v26 = vpop.f32.mrb[157].mxu0 }
 0x776   :  { %v2907_v27 = vadd.f32 %v2906_v26, %v2905_v25  ;;  %v2908_v29 = vpop.f32.mrb[158].mxu0  ;;  %v1999_v30 = vpack.c.bf16 %v1970_v23, %v1969_v17 }
 0x777   :  { %v2909_v34 = vpop.f32.mrb[159].mxu0 }
 0x778   :  { %v1863_v35 = vadd.f32 %v2907_v27, %v4274_v24  ;;  %v2910_v38 = vadd.f32 %v2909_v34, %v2908_v29  ;;  %3331 = vmatprep.mubr.bf16.mxu1 %v1999_v30 }
 0x77a   :  { %v1866_v39 = vadd.f32 %v2910_v38, %v4274_v24  ;;  %v1971_v40 = vmax.f32 %v1863_v35, 0.0 }
 0x77c   :  { %v1972_v41 = vmax.f32 %v1866_v39, 0.0  ;;  %v2911_v42 = vpop.f32.mrb[160].mxu0 }
 0x77d   :  { %v2912_v50 = vpop.f32.mrb[161].mxu0 }
 0x77e   :  { %v2913_v18 = vadd.f32 %v2912_v50, %v2911_v42  ;;  %v2914_v52 = vpop.f32.mrb[162].mxu0  ;;  %v2000_v53 = vpack.c.bf16 %v1972_v41, %v1971_v40 }
 0x77f   :  { %v2915_v54 = vpop.f32.mrb[163].mxu0 }
 0x780   :  { %v1871_v55 = vadd.f32 %v2913_v18, %v4274_v24  ;;  %v2916_v56 = vadd.f32 %v2915_v54, %v2914_v52  ;;  %3332 = vmatmul.mubr.bf16.gmra.mrb[116].mxu1 %v2000_v53 }
 0x782   :  { %v1874_v57 = vadd.f32 %v2916_v56, %v4274_v24  ;;  %v1973_v58 = vmax.f32 %v1871_v55, 0.0 }
 0x784   :  { %v1974_v59 = vmax.f32 %v1874_v57, 0.0  ;;  %v2917_v60 = vpop.f32.mrb[164].mxu0 }
 0x785   :  { %v2918_v61 = vpop.f32.mrb[165].mxu0 }
 0x786   :  { %v2919_v62 = vadd.f32 %v2918_v61, %v2917_v60  ;;  %v2920_v8 = vpop.f32.mrb[166].mxu0  ;;  %v2001_v9 = vpack.c.bf16 %v1974_v59, %v1973_v58 }
 0x787   :  { %v2921_v13 = vpop.f32.mrb[167].mxu0 }
 0x788   :  { %v1879_v14 = vadd.f32 %v2919_v62, %v4274_v24  ;;  %v2922_v17 = vadd.f32 %v2921_v13, %v2920_v8  ;;  %3335 = vmatprep.mubr.bf16.mxu1 %v2001_v9 }
 0x78a   :  { %v1882_v23 = vadd.f32 %v2922_v17, %v4274_v24  ;;  %v1975_v25 = vmax.f32 %v1879_v14, 0.0 }
 0x78c   :  { %v1976_v26 = vmax.f32 %v1882_v23, 0.0  ;;  %v2923_v27 = vpop.f32.mrb[168].mxu0 }
 0x78d   :  { %v2924_v29 = vpop.f32.mrb[169].mxu0 }
 0x78e   :  { %v2925_v30 = vadd.f32 %v2924_v29, %v2923_v27  ;;  %v2926_v34 = vpop.f32.mrb[170].mxu0  ;;  %v2002_v35 = vpack.c.bf16 %v1976_v26, %v1975_v25 }
 0x78f   :  { %v2927_v38 = vpop.f32.mrb[171].mxu0 }
 0x790   :  { %v1887_v39 = vadd.f32 %v2925_v30, %v4274_v24  ;;  %v2928_v40 = vadd.f32 %v2927_v38, %v2926_v34  ;;  %3336 = vmatmul.mubr.bf16.gmra.mrb[120].mxu1 %v2002_v35 }
 0x792   :  { %v1890_v41 = vadd.f32 %v2928_v40, %v4274_v24  ;;  %v1977_v42 = vmax.f32 %v1887_v39, 0.0 }
 0x794   :  { %v1978_v50 = vmax.f32 %v1890_v41, 0.0  ;;  %v2929_v18 = vpop.f32.mrb[172].mxu0 }
 0x795   :  { %v2930_v52 = vpop.f32.mrb[173].mxu0 }
 0x796   :  { %v2931_v53 = vadd.f32 %v2930_v52, %v2929_v18  ;;  %v2932_v54 = vpop.f32.mrb[174].mxu0  ;;  %v2003_v55 = vpack.c.bf16 %v1978_v50, %v1977_v42 }
 0x797   :  { %v2933_v56 = vpop.f32.mrb[175].mxu0 }
 0x798   :  { %v1895_v57 = vadd.f32 %v2931_v53, %v4274_v24  ;;  %v2934_v58 = vadd.f32 %v2933_v56, %v2932_v54  ;;  %3339 = vmatprep.mubr.bf16.mxu1 %v2003_v55 }
 0x79a   :  { %v1898_v59 = vadd.f32 %v2934_v58, %v4274_v24  ;;  %v1979_v60 = vmax.f32 %v1895_v57, 0.0 }
 0x79c   :  { %v1980_v61 = vmax.f32 %v1898_v59, 0.0  ;;  %v2935_v62 = vpop.f32.mrb[176].mxu0 }
 0x79d   :  { %v2936_v8 = vpop.f32.mrb[177].mxu0 }
 0x79e   :  { %v2937_v9 = vadd.f32 %v2936_v8, %v2935_v62  ;;  %v2938_v13 = vpop.f32.mrb[178].mxu0  ;;  %v2004_v14 = vpack.c.bf16 %v1980_v61, %v1979_v60 }
 0x79f   :  { %v2939_v17 = vpop.f32.mrb[179].mxu0 }
 0x7a0   :  { %v1903_v23 = vadd.f32 %v2937_v9, %v4274_v24  ;;  %v2940_v25 = vadd.f32 %v2939_v17, %v2938_v13  ;;  %3340 = vmatmul.mubr.bf16.gmra.mrb[124].mxu1 %v2004_v14 }
 0x7a2   :  { %v1906_v26 = vadd.f32 %v2940_v25, %v4274_v24  ;;  %v1981_v27 = vmax.f32 %v1903_v23, 0.0 }
 0x7a4   :  { %v1982_v29 = vmax.f32 %v1906_v26, 0.0  ;;  %v2941_v30 = vpop.f32.mrb[180].mxu0 }
 0x7a5   :  { %v2942_v34 = vpop.f32.mrb[181].mxu0 }
 0x7a6   :  { %v2943_v35 = vadd.f32 %v2942_v34, %v2941_v30  ;;  %v2944_v38 = vpop.f32.mrb[182].mxu0  ;;  %v2005_v39 = vpack.c.bf16 %v1982_v29, %v1981_v27 }
 0x7a7   :  { %v2945_v40 = vpop.f32.mrb[183].mxu0 }
 0x7a8   :  { %v1911_v41 = vadd.f32 %v2943_v35, %v4274_v24  ;;  %v2946_v42 = vadd.f32 %v2945_v40, %v2944_v38  ;;  %3343 = vmatprep.mubr.bf16.mxu1 %v2005_v39 }
 0x7aa   :  { %v1914_v50 = vadd.f32 %v2946_v42, %v4274_v24  ;;  %v1983_v18 = vmax.f32 %v1911_v41, 0.0 }
 0x7ac   :  { %v1984_v52 = vmax.f32 %v1914_v50, 0.0  ;;  %v2947_v53 = vpop.f32.mrb[184].mxu0 }
 0x7ad   :  { %v2948_v54 = vpop.f32.mrb[185].mxu0 }
 0x7ae   :  { %v2949_v55 = vadd.f32 %v2948_v54, %v2947_v53  ;;  %v2950_v56 = vpop.f32.mrb[186].mxu0  ;;  %v2006_v57 = vpack.c.bf16 %v1984_v52, %v1983_v18 }
 0x7af   :  { %v2951_v58 = vpop.f32.mrb[187].mxu0 }
 0x7b0   :  { %v1919_v59 = vadd.f32 %v2949_v55, %v4274_v24  ;;  %v2952_v60 = vadd.f32 %v2951_v58, %v2950_v56  ;;  %3344 = vmatmul.mubr.bf16.gmra.mrb[128].mxu1 %v2006_v57 }
 0x7b2   :  { %v1922_v61 = vadd.f32 %v2952_v60, %v4274_v24  ;;  %v1985_v62 = vmax.f32 %v1919_v59, 0.0 }
 0x7b4   :  { %v1986_v8 = vmax.f32 %v1922_v61, 0.0  ;;  %v2953_v9 = vpop.f32.mrb[188].mxu0 }
 0x7b5   :  { %v2954_v13 = vpop.f32.mrb[189].mxu0 }
 0x7b6   :  { %v2955_v14 = vadd.f32 %v2954_v13, %v2953_v9  ;;  %v2956_v17 = vpop.f32.mrb[190].mxu0  ;;  %v2007_v23 = vpack.c.bf16 %v1986_v8, %v1985_v62 }
 0x7b7   :  { %v2957_v25 = vpop.f32.mrb[191].mxu0 }
 0x7b8   :  { %v1927_v26 = vadd.f32 %v2955_v14, %v4274_v24  ;;  %v2958_v27 = vadd.f32 %v2957_v25, %v2956_v17  ;;  %3347 = vmatprep.mubr.bf16.mxu1 %v2007_v23 }
 0x7ba   :  { %v1930_v29 = vadd.f32 %v2958_v27, %v4274_v24  ;;  %v1987_v30 = vmax.f32 %v1927_v26, 0.0 }
 0x7bc   :  { %v1988_v34 = vmax.f32 %v1930_v29, 0.0  ;;  %v2959_v35 = vpop.f32.mrb[192].mxu0 }
 0x7bd   :  { %v2960_v38 = vpop.f32.mrb[193].mxu0 }
 0x7be   :  { %v2961_v39 = vadd.f32 %v2960_v38, %v2959_v35  ;;  %v2962_v40 = vpop.f32.mrb[194].mxu0  ;;  %v2008_v41 = vpack.c.bf16 %v1988_v34, %v1987_v30 }
 0x7bf   :  { %v2963_v42 = vpop.f32.mrb[195].mxu0 }
 0x7c0   :  { %v1935_v50 = vadd.f32 %v2961_v39, %v4274_v24  ;;  %v2964_v18 = vadd.f32 %v2963_v42, %v2962_v40  ;;  %3348 = vmatmul.mubr.bf16.gmra.mrb[132].mxu1 %v2008_v41 }
 0x7c2   :  { %v1938_v52 = vadd.f32 %v2964_v18, %v4274_v24  ;;  %v1989_v53 = vmax.f32 %v1935_v50, 0.0 }
 0x7c4   :  { %v1990_v54 = vmax.f32 %v1938_v52, 0.0  ;;  %v2965_v55 = vpop.f32.mrb[196].mxu0 }
 0x7c5   :  { %v2966_v56 = vpop.f32.mrb[197].mxu0 }
 0x7c6   :  { %v2967_v57 = vadd.f32 %v2966_v56, %v2965_v55  ;;  %v2968_v58 = vpop.f32.mrb[198].mxu0  ;;  %v2009_v59 = vpack.c.bf16 %v1990_v54, %v1989_v53 }
 0x7c7   :  { %v2969_v60 = vpop.f32.mrb[199].mxu0 }
 0x7c8   :  { %v1943_v61 = vadd.f32 %v2967_v57, %v4274_v24  ;;  %v2970_v62 = vadd.f32 %v2969_v60, %v2968_v58  ;;  %3351 = vmatprep.mubr.bf16.mxu1 %v2009_v59 }
 0x7ca   :  { %v1946_v8 = vadd.f32 %v2970_v62, %v4274_v24  ;;  %v1991_v9 = vmax.f32 %v1943_v61, 0.0 }
 0x7cc   :  { %v1992_v13 = vmax.f32 %v1946_v8, 0.0  ;;  %v2971_v14 = vpop.f32.mrb[200].mxu0 }
 0x7cd   :  { %v2972_v17 = vpop.f32.mrb[201].mxu0 }
 0x7ce   :  { %v2973_v23 = vadd.f32 %v2972_v17, %v2971_v14  ;;  %v2974_v25 = vpop.f32.mrb[202].mxu0  ;;  %v2010_v26 = vpack.c.bf16 %v1992_v13, %v1991_v9 }
 0x7cf   :  { %v2975_v27 = vpop.f32.mrb[203].mxu0 }
 0x7d0   :  { %v1951_v29 = vadd.f32 %v2973_v23, %v4274_v24  ;;  %v2976_v30 = vadd.f32 %v2975_v27, %v2974_v25  ;;  %3352 = vmatmul.mubr.bf16.gmra.mrb[136].mxu1 %v2010_v26 }
 0x7d2   :  { %v1954_v34 = vadd.f32 %v2976_v30, %v4274_v24  ;;  %v1993_v35 = vmax.f32 %v1951_v29, 0.0 }
 0x7d4   :  { %v1994_v38 = vmax.f32 %v1954_v34, 0.0  ;;  %v2977_v39 = vpop.f32.mrb[204].mxu0 }
 0x7d5   :  { %v2978_v40 = vpop.f32.mrb[205].mxu0 }
 0x7d6   :  { %v2979_v41 = vadd.f32 %v2978_v40, %v2977_v39  ;;  %v2980_v42 = vpop.f32.mrb[206].mxu0  ;;  %v2011_v50 = vpack.c.bf16 %v1994_v38, %v1993_v35 }
 0x7d7   :  { %v2981_v18 = vpop.f32.mrb[207].mxu0 }
 0x7d8   :  { %v1959_v52 = vadd.f32 %v2979_v41, %v4274_v24  ;;  %v2982_v53 = vadd.f32 %v2981_v18, %v2980_v42  ;;  %3355 = vmatprep.mubr.bf16.mxu1 %v2011_v50 }
 0x7da   :  { %v1962_v54 = vadd.f32 %v2982_v53, %v4274_v24  ;;  %v1995_v55 = vmax.f32 %v1959_v52, 0.0 }
 0x7dc   :  { %v1996_v56 = vmax.f32 %v1962_v54, 0.0 }
 0x7de   :  { %v2012_v57 = vpack.c.bf16 %v1996_v56, %v1995_v55 }
 0x7e0   :  { %3356 = vmatmul.mubr.bf16.gmra.mrb[140].mxu1 %v2012_v57 }
 0x7e1   :  { %2293 = vmatprep.mubr.bf16.mxu1 %v4058_v28 }
 0x843   :  { %v3329_v58 = vpop.f32.mrb[112].mxu1 }
 0x844   :  { %v2111_v59 = vpop.f32.mrb[113].mxu1 }
 0x845   :  { %v3330_v60 = vpop.f32.mrb[114].mxu1 }
 0x846   :  { %v2239_v61 = vpack.c.bf16 %v3330_v60, %v3329_v58  ;;  %v2114_v62 = vpop.f32.mrb[115].mxu1 }
 0x847   :  { %v2238_v8 = vpack.c.bf16 %v2114_v62, %v2111_v59 }
 0x853   :  { %v3333_v9 = vpop.f32.mrb[116].mxu1 }
 0x854   :  { %v2127_v13 = vpop.f32.mrb[117].mxu1 }
 0x855   :  { %v3334_v14 = vpop.f32.mrb[118].mxu1 }
 0x856   :  { %v2241_v17 = vpack.c.bf16 %v3334_v14, %v3333_v9  ;;  %v2130_v23 = vpop.f32.mrb[119].mxu1 }
 0x857   :  { %v2240_v25 = vpack.c.bf16 %v2130_v23, %v2127_v13 }
 0x863   :  { %v3337_v26 = vpop.f32.mrb[120].mxu1 }
 0x864   :  { %v2143_v24 = vpop.f32.mrb[121].mxu1 }
 0x865   :  { %v3338_v27 = vpop.f32.mrb[122].mxu1 }
 0x866   :  { %v2243_v29 = vpack.c.bf16 %v3338_v27, %v3337_v26  ;;  %v2146_v30 = vpop.f32.mrb[123].mxu1 }
 0x867   :  { %v2242_v34 = vpack.c.bf16 %v2146_v30, %v2143_v24 }
 0x873   :  { %v3341_v35 = vpop.f32.mrb[124].mxu1 }
 0x874   :  { %v2159_v28 = vpop.f32.mrb[125].mxu1 }
 0x875   :  { %v3342_v38 = vpop.f32.mrb[126].mxu1 }
 0x876   :  { %v2245_v39 = vpack.c.bf16 %v3342_v38, %v3341_v35  ;;  %v2162_v40 = vpop.f32.mrb[127].mxu1 }
 0x877   :  { %v2244_v41 = vpack.c.bf16 %v2162_v40, %v2159_v28 }
 0x883   :  { %v3345_v42 = vpop.f32.mrb[128].mxu1 }
 0x884   :  { %v2175_v50 = vpop.f32.mrb[129].mxu1 }
 0x885   :  { %v3346_v18 = vpop.f32.mrb[130].mxu1 }
 0x886   :  { %v2247_v52 = vpack.c.bf16 %v3346_v18, %v3345_v42  ;;  %v2178_v53 = vpop.f32.mrb[131].mxu1 }
 0x887   :  { %v2246_v54 = vpack.c.bf16 %v2178_v53, %v2175_v50 }
 0x889   :  { %3007 = vmatprep.subr.bf16.mxu1 %v2246_v54 }
 0x88a   :  { %3008 = vmatpush3.bf16.msra.mxu1 %v2238_v8 }
 0x88b   :  { %3009 = vmatprep.subr.bf16.mxu1 %v2247_v52 }
 0x88e   :  { %3010 = vmatpush3.bf16.msra.mxu1 %v2239_v61 }
 0x893   :  { %v3349_v55 = vpop.f32.mrb[132].mxu1 }
 0x894   :  { %v2191_v56 = vpop.f32.mrb[133].mxu1 }
 0x895   :  { %v3350_v57 = vpop.f32.mrb[134].mxu1 }
 0x896   :  { %v2249_v58 = vpack.c.bf16 %v3350_v57, %v3349_v55  ;;  %v2194_v59 = vpop.f32.mrb[135].mxu1 }
 0x897   :  { %v2248_v60 = vpack.c.bf16 %v2194_v59, %v2191_v56 }
 0x899   :  { %3011 = vmatprep.subr.bf16.mxu1 %v2248_v60 }
 0x89a   :  { %3012 = vmatpush3.bf16.msra.mxu1 %v2240_v25 }
 0x89b   :  { %3013 = vmatprep.subr.bf16.mxu1 %v2249_v58 }
 0x89e   :  { %3014 = vmatpush3.bf16.msra.mxu1 %v2241_v17 }
 0x8a3   :  { %v3353_v62 = vpop.f32.mrb[136].mxu1 }
 0x8a4   :  { %v2207_v9 = vpop.f32.mrb[137].mxu1 }
 0x8a5   :  { %v3354_v13 = vpop.f32.mrb[138].mxu1 }
 0x8a6   :  { %v2251_v14 = vpack.c.bf16 %v3354_v13, %v3353_v62  ;;  %v2210_v23 = vpop.f32.mrb[139].mxu1 }
 0x8a7   :  { %v2250_v26 = vpack.c.bf16 %v2210_v23, %v2207_v9 }
 0x8a9   :  { %3015 = vmatprep.subr.bf16.mxu1 %v2250_v26 }
 0x8aa   :  { %3016 = vmatpush3.bf16.msra.mxu1 %v2242_v34 }
 0x8ab   :  { %3017 = vmatprep.subr.bf16.mxu1 %v2251_v14 }
 0x8ae   :  { %3018 = vmatpush3.bf16.msra.mxu1 %v2243_v29 }
 0x8b3   :  { %v3357_v61 = vpop.f32.mrb[140].mxu1 }
 0x8b4   :  { %v2223_v8 = vpop.f32.mrb[141].mxu1 }
 0x8b5   :  { %v3358_v24 = vpop.f32.mrb[142].mxu1 }
 0x8b6   :  { %v2253_v27 = vpack.c.bf16 %v3358_v24, %v3357_v61  ;;  %v2226_v30 = vpop.f32.mrb[143].mxu1 }
 0x8b7   :  { %v2252_v35 = vpack.c.bf16 %v2226_v30, %v2223_v8 }
 0x8b9   :  { %3019 = vmatprep.subr.bf16.mxu1 %v2252_v35 }
 0x8ba   :  { %3020 = vmatpush3.bf16.msra.mxu1 %v2244_v41 }
 0x8bb   :  { %3021 = vmatprep.subr.bf16.mxu1 %v2253_v27 }
 0x8be   :  { %3022 = vmatpush3.bf16.msra.mxu1 %v2245_v39 }
 0x8c1   :  { %2294 = vmatmul.mubr.bf16.vlgmr.msra.gmra.mrb[144].mxu1 %v4073_v63 }
 0x8c2   :  { %2301 = vmatprep.mubr.bf16.mxu1 %v4079_v0  ;;  %v4343_v0 = vld [vmem:[%s4484_s11] ss:$0 sm:$0xff] }
 0x8c9   :  { %2302 = vmatmul.mubr.bf16.gmra.mrb[148].mxu1 %v4085_v1 }
 0x8ca   :  { %2309 = vmatprep.mubr.bf16.mxu1 %v4091_v2 }
 0x8d1   :  { %2310 = vmatmul.mubr.bf16.gmra.mrb[152].mxu1 %v4097_v3 }
 0x8d2   :  { %2317 = vmatprep.mubr.bf16.mxu1 %v4103_v7 }
 0x8d9   :  { %2318 = vmatmul.mubr.bf16.gmra.mrb[156].mxu1 %v4109_v31 }
 0x8da   :  { %2325 = vmatprep.mubr.bf16.mxu1 %v4115_v33 }
 0x8e1   :  { %2326 = vmatmul.mubr.bf16.gmra.mrb[160].mxu1 %v4121_v36 }
 0x8e2   :  { %2333 = vmatprep.mubr.bf16.mxu1 %v4127_v43 }
 0x8e9   :  { %2334 = vmatmul.mubr.bf16.gmra.mrb[164].mxu1 %v4133_v46 }
 0x8ea   :  { %2341 = vmatprep.mubr.bf16.mxu1 %v4139_v5 }
 0x8f1   :  { %2342 = vmatmul.mubr.bf16.gmra.mrb[168].mxu1 %v4145_v44 }
 0x8f2   :  { %2349 = vmatprep.mubr.bf16.mxu1 %v4151_v47 }
 0x8f9   :  { %2350 = vmatmul.mubr.bf16.gmra.mrb[172].mxu1 %v4157_v49 }
 0x8fa   :  { %2357 = vmatprep.mubr.bf16.mxu1 %v4163_v51 }
 0x901   :  { %2358 = vmatmul.mubr.bf16.gmra.mrb[176].mxu1 %v4169_v37 }
 0x902   :  { %2365 = vmatprep.mubr.bf16.mxu1 %v4175_v45 }
 0x909   :  { %2366 = vmatmul.mubr.bf16.gmra.mrb[180].mxu1 %v4181_v48 }
 0x90a   :  { %2373 = vmatprep.mubr.bf16.mxu1 %v4187_v4 }
 0x911   :  { %2374 = vmatmul.mubr.bf16.gmra.mrb[184].mxu1 %v4193_v12 }
 0x912   :  { %2381 = vmatprep.mubr.bf16.mxu1 %v4199_v6 }
 0x919   :  { %2382 = vmatmul.mubr.bf16.gmra.mrb[188].mxu1 %v4211_v10 }
 0x91a   :  { %2389 = vmatprep.mubr.bf16.mxu1 %v4217_v11 }
 0x921   :  { %2390 = vmatmul.mubr.bf16.gmra.mrb[192].mxu1 %v4229_v15 }
 0x922   :  { %2397 = vmatprep.mubr.bf16.mxu1 %v4235_v16 }
 0x929   :  { %2398 = vmatmul.mubr.bf16.gmra.mrb[196].mxu1 %v4244_v19 }
 0x92a   :  { %2405 = vmatprep.mubr.bf16.mxu1 %v4250_v20 }
 0x931   :  { %2406 = vmatmul.mubr.bf16.gmra.mrb[200].mxu1 %v4256_v21 }
 0x932   :  { %2413 = vmatprep.mubr.bf16.mxu1 %v4262_v22 }
 0x939   :  { %2414 = vmatmul.mubr.bf16.gmra.mrb[204].mxu1 %v4268_v32 }
 0x994   :  { %v3023_v63 = vpop.f32.mrb[144].mxu1 }
 0x995   :  { %v3024_v1 = vpop.f32.mrb[145].mxu1 }
 0x996   :  { %v3025_v2 = vadd.f32 %v3024_v1, %v3023_v63  ;;  %v3026_v3 = vpop.f32.mrb[146].mxu1 }
 0x997   :  { %v3027_v7 = vpop.f32.mrb[147].mxu1 }
 0x998   :  { %v2296_v31 = vadd.f32 %v3025_v2, %v4343_v0  ;;  %v3028_v33 = vadd.f32 %v3027_v7, %v3026_v3 }
 0x99a   :  { %2422 = vst [vmem:[%s4485_s12] sm:$0xff] %v2296_v31  ;;  %v2299_v36 = vadd.f32 %v3028_v33, %v4343_v0 }
 0x99c   :  { %2423 = vst [vmem:[%s4485_s12 + $0x8] sm:$0xff] %v2299_v36  ;;  %v3029_v43 = vpop.f32.mrb[148].mxu1 }
 0x99d   :  { %v3030_v46 = vpop.f32.mrb[149].mxu1 }
 0x99e   :  { %v3031_v5 = vadd.f32 %v3030_v46, %v3029_v43  ;;  %v3032_v44 = vpop.f32.mrb[150].mxu1 }
 0x99f   :  { %v3033_v47 = vpop.f32.mrb[151].mxu1 }
 0x9a0   :  { %v2304_v49 = vadd.f32 %v3031_v5, %v4343_v0  ;;  %v3034_v51 = vadd.f32 %v3033_v47, %v3032_v44 }
 0x9a2   :  { %2424 = vst [vmem:[%s4485_s12 + $0x10] sm:$0xff] %v2304_v49  ;;  %v2307_v37 = vadd.f32 %v3034_v51, %v4343_v0 }
 0x9a4   :  { %2425 = vst [vmem:[%s4485_s12 + $0x18] sm:$0xff] %v2307_v37  ;;  %v3035_v45 = vpop.f32.mrb[152].mxu1 }
 0x9a5   :  { %v3036_v48 = vpop.f32.mrb[153].mxu1 }
 0x9a6   :  { %v3037_v4 = vadd.f32 %v3036_v48, %v3035_v45  ;;  %v3038_v12 = vpop.f32.mrb[154].mxu1 }
 0x9a7   :  { %v3039_v6 = vpop.f32.mrb[155].mxu1 }
 0x9a8   :  { %v2312_v10 = vadd.f32 %v3037_v4, %v4343_v0  ;;  %v3040_v11 = vadd.f32 %v3039_v6, %v3038_v12 }
 0x9aa   :  { %2426 = vst [vmem:[%s4485_s12 + $0x20] sm:$0xff] %v2312_v10  ;;  %v2315_v15 = vadd.f32 %v3040_v11, %v4343_v0 }
 0x9ac   :  { %2427 = vst [vmem:[%s4485_s12 + $0x28] sm:$0xff] %v2315_v15  ;;  %v3041_v16 = vpop.f32.mrb[156].mxu1 }
 0x9ad   :  { %v3042_v19 = vpop.f32.mrb[157].mxu1 }
 0x9ae   :  { %v3043_v20 = vadd.f32 %v3042_v19, %v3041_v16  ;;  %v3044_v21 = vpop.f32.mrb[158].mxu1 }
 0x9af   :  { %v3045_v22 = vpop.f32.mrb[159].mxu1 }
 0x9b0   :  { %v2320_v32 = vadd.f32 %v3043_v20, %v4343_v0  ;;  %v3046_v17 = vadd.f32 %v3045_v22, %v3044_v21 }
 0x9b2   :  { %2428 = vst [vmem:[%s4485_s12 + $0x30] sm:$0xff] %v2320_v32  ;;  %v2323_v25 = vadd.f32 %v3046_v17, %v4343_v0 }
 0x9b4   :  { %2429 = vst [vmem:[%s4485_s12 + $0x38] sm:$0xff] %v2323_v25  ;;  %v3047_v29 = vpop.f32.mrb[160].mxu1 }
 0x9b5   :  { %v3048_v34 = vpop.f32.mrb[161].mxu1 }
 0x9b6   :  { %v3049_v28 = vadd.f32 %v3048_v34, %v3047_v29  ;;  %v3050_v38 = vpop.f32.mrb[162].mxu1 }
 0x9b7   :  { %v3051_v39 = vpop.f32.mrb[163].mxu1 }
 0x9b8   :  { %v2328_v40 = vadd.f32 %v3049_v28, %v4343_v0  ;;  %v3052_v41 = vadd.f32 %v3051_v39, %v3050_v38 }
 0x9ba   :  { %2430 = vst [vmem:[%s4485_s12 + $0x40] sm:$0xff] %v2328_v40  ;;  %v2331_v42 = vadd.f32 %v3052_v41, %v4343_v0 }
 0x9bc   :  { %2431 = vst [vmem:[%s4485_s12 + $0x48] sm:$0xff] %v2331_v42  ;;  %v3053_v50 = vpop.f32.mrb[164].mxu1 }
 0x9bd   :  { %v3054_v18 = vpop.f32.mrb[165].mxu1 }
 0x9be   :  { %v3055_v52 = vadd.f32 %v3054_v18, %v3053_v50  ;;  %v3056_v53 = vpop.f32.mrb[166].mxu1 }
 0x9bf   :  { %v3057_v54 = vpop.f32.mrb[167].mxu1 }
 0x9c0   :  { %v2336_v55 = vadd.f32 %v3055_v52, %v4343_v0  ;;  %v3058_v56 = vadd.f32 %v3057_v54, %v3056_v53 }
 0x9c2   :  { %2432 = vst [vmem:[%s4485_s12 + $0x50] sm:$0xff] %v2336_v55  ;;  %v2339_v57 = vadd.f32 %v3058_v56, %v4343_v0 }
 0x9c4   :  { %2433 = vst [vmem:[%s4485_s12 + $0x58] sm:$0xff] %v2339_v57  ;;  %v3059_v58 = vpop.f32.mrb[168].mxu1 }
 0x9c5   :  { %v3060_v59 = vpop.f32.mrb[169].mxu1 }
 0x9c6   :  { %v3061_v60 = vadd.f32 %v3060_v59, %v3059_v58  ;;  %v3062_v62 = vpop.f32.mrb[170].mxu1 }
 0x9c7   :  { %v3063_v9 = vpop.f32.mrb[171].mxu1 }
 0x9c8   :  { %v2344_v13 = vadd.f32 %v3061_v60, %v4343_v0  ;;  %v3064_v14 = vadd.f32 %v3063_v9, %v3062_v62 }
 0x9ca   :  { %2434 = vst [vmem:[%s4485_s12 + $0x60] sm:$0xff] %v2344_v13  ;;  %v2347_v23 = vadd.f32 %v3064_v14, %v4343_v0 }
 0x9cc   :  { %2435 = vst [vmem:[%s4485_s12 + $0x68] sm:$0xff] %v2347_v23  ;;  %v3065_v26 = vpop.f32.mrb[172].mxu1 }
 0x9cd   :  { %v3066_v61 = vpop.f32.mrb[173].mxu1 }
 0x9ce   :  { %v3067_v8 = vadd.f32 %v3066_v61, %v3065_v26  ;;  %v3068_v24 = vpop.f32.mrb[174].mxu1 }
 0x9cf   :  { %v3069_v27 = vpop.f32.mrb[175].mxu1 }
 0x9d0   :  { %v2352_v30 = vadd.f32 %v3067_v8, %v4343_v0  ;;  %v3070_v35 = vadd.f32 %v3069_v27, %v3068_v24 }
 0x9d2   :  { %2436 = vst [vmem:[%s4485_s12 + $0x70] sm:$0xff] %v2352_v30  ;;  %v2355_v63 = vadd.f32 %v3070_v35, %v4343_v0 }
 0x9d4   :  { %2437 = vst [vmem:[%s4485_s12 + $0x78] sm:$0xff] %v2355_v63  ;;  %v3071_v1 = vpop.f32.mrb[176].mxu1 }
 0x9d5   :  { %v3072_v2 = vpop.f32.mrb[177].mxu1 }
 0x9d6   :  { %v3073_v3 = vadd.f32 %v3072_v2, %v3071_v1  ;;  %v3074_v7 = vpop.f32.mrb[178].mxu1 }
 0x9d7   :  { %v3075_v31 = vpop.f32.mrb[179].mxu1 }
 0x9d8   :  { %v2360_v33 = vadd.f32 %v3073_v3, %v4343_v0  ;;  %v3076_v36 = vadd.f32 %v3075_v31, %v3074_v7 }
 0x9da   :  { %2438 = vst [vmem:[%s4485_s12 + $0x80] sm:$0xff] %v2360_v33  ;;  %v2363_v43 = vadd.f32 %v3076_v36, %v4343_v0 }
 0x9dc   :  { %2439 = vst [vmem:[%s4485_s12 + $0x88] sm:$0xff] %v2363_v43  ;;  %v3077_v46 = vpop.f32.mrb[180].mxu1 }
 0x9dd   :  { %v3078_v5 = vpop.f32.mrb[181].mxu1 }
 0x9de   :  { %v3079_v44 = vadd.f32 %v3078_v5, %v3077_v46  ;;  %v3080_v47 = vpop.f32.mrb[182].mxu1 }
 0x9df   :  { %v3081_v49 = vpop.f32.mrb[183].mxu1 }
 0x9e0   :  { %v2368_v51 = vadd.f32 %v3079_v44, %v4343_v0  ;;  %v3082_v37 = vadd.f32 %v3081_v49, %v3080_v47 }
 0x9e2   :  { %2440 = vst [vmem:[%s4485_s12 + $0x90] sm:$0xff] %v2368_v51  ;;  %v2371_v45 = vadd.f32 %v3082_v37, %v4343_v0 }
 0x9e4   :  { %2441 = vst [vmem:[%s4485_s12 + $0x98] sm:$0xff] %v2371_v45  ;;  %v3083_v48 = vpop.f32.mrb[184].mxu1 }
 0x9e5   :  { %v3084_v4 = vpop.f32.mrb[185].mxu1 }
 0x9e6   :  { %v3085_v12 = vadd.f32 %v3084_v4, %v3083_v48  ;;  %v3086_v6 = vpop.f32.mrb[186].mxu1 }
 0x9e7   :  { %v3087_v10 = vpop.f32.mrb[187].mxu1 }
 0x9e8   :  { %v2376_v11 = vadd.f32 %v3085_v12, %v4343_v0  ;;  %v3088_v15 = vadd.f32 %v3087_v10, %v3086_v6 }
 0x9ea   :  { %2442 = vst [vmem:[%s4485_s12 + $0xa0] sm:$0xff] %v2376_v11  ;;  %v2379_v16 = vadd.f32 %v3088_v15, %v4343_v0 }
 0x9ec   :  { %2443 = vst [vmem:[%s4485_s12 + $0xa8] sm:$0xff] %v2379_v16  ;;  %v3089_v19 = vpop.f32.mrb[188].mxu1 }
 0x9ed   :  { %v3090_v20 = vpop.f32.mrb[189].mxu1 }
 0x9ee   :  { %v3091_v21 = vadd.f32 %v3090_v20, %v3089_v19  ;;  %v3092_v22 = vpop.f32.mrb[190].mxu1 }
 0x9ef   :  { %v3093_v32 = vpop.f32.mrb[191].mxu1 }
 0x9f0   :  { %v2384_v17 = vadd.f32 %v3091_v21, %v4343_v0  ;;  %v3094_v25 = vadd.f32 %v3093_v32, %v3092_v22 }
 0x9f2   :  { %2444 = vst [vmem:[%s4485_s12 + $0xb0] sm:$0xff] %v2384_v17  ;;  %v2387_v29 = vadd.f32 %v3094_v25, %v4343_v0 }
 0x9f4   :  { %2445 = vst [vmem:[%s4485_s12 + $0xb8] sm:$0xff] %v2387_v29  ;;  %v3095_v34 = vpop.f32.mrb[192].mxu1 }
 0x9f5   :  { %v3096_v28 = vpop.f32.mrb[193].mxu1 }
 0x9f6   :  { %v3097_v38 = vadd.f32 %v3096_v28, %v3095_v34  ;;  %v3098_v39 = vpop.f32.mrb[194].mxu1 }
 0x9f7   :  { %v3099_v40 = vpop.f32.mrb[195].mxu1 }
 0x9f8   :  { %v2392_v41 = vadd.f32 %v3097_v38, %v4343_v0  ;;  %v3100_v42 = vadd.f32 %v3099_v40, %v3098_v39 }
 0x9fa   :  { %2446 = vst [vmem:[%s4485_s12 + $0xc0] sm:$0xff] %v2392_v41  ;;  %v2395_v50 = vadd.f32 %v3100_v42, %v4343_v0 }
 0x9fc   :  { %2447 = vst [vmem:[%s4485_s12 + $0xc8] sm:$0xff] %v2395_v50  ;;  %v3101_v18 = vpop.f32.mrb[196].mxu1 }
 0x9fd   :  { %v3102_v52 = vpop.f32.mrb[197].mxu1 }
 0x9fe   :  { %v3103_v53 = vadd.f32 %v3102_v52, %v3101_v18  ;;  %v3104_v54 = vpop.f32.mrb[198].mxu1 }
 0x9ff   :  { %v3105_v55 = vpop.f32.mrb[199].mxu1 }
 0xa00   :  { %v2400_v56 = vadd.f32 %v3103_v53, %v4343_v0  ;;  %v3106_v57 = vadd.f32 %v3105_v55, %v3104_v54 }
 0xa02   :  { %2448 = vst [vmem:[%s4485_s12 + $0xd0] sm:$0xff] %v2400_v56  ;;  %v2403_v58 = vadd.f32 %v3106_v57, %v4343_v0 }
 0xa04   :  { %2449 = vst [vmem:[%s4485_s12 + $0xd8] sm:$0xff] %v2403_v58  ;;  %v3107_v59 = vpop.f32.mrb[200].mxu1 }
 0xa05   :  { %v3108_v60 = vpop.f32.mrb[201].mxu1 }
 0xa06   :  { %v3109_v62 = vadd.f32 %v3108_v60, %v3107_v59  ;;  %v3110_v9 = vpop.f32.mrb[202].mxu1 }
 0xa07   :  { %v3111_v13 = vpop.f32.mrb[203].mxu1 }
 0xa08   :  { %v2408_v14 = vadd.f32 %v3109_v62, %v4343_v0  ;;  %v3112_v23 = vadd.f32 %v3111_v13, %v3110_v9 }
 0xa0a   :  { %2450 = vst [vmem:[%s4485_s12 + $0xe0] sm:$0xff] %v2408_v14  ;;  %v2411_v26 = vadd.f32 %v3112_v23, %v4343_v0 }
 0xa0c   :  { %2451 = vst [vmem:[%s4485_s12 + $0xe8] sm:$0xff] %v2411_v26  ;;  %v3113_v61 = vpop.f32.mrb[204].mxu1 }
 0xa0d   :  { %v3114_v8 = vpop.f32.mrb[205].mxu1 }
 0xa0e   :  { %v3115_v24 = vadd.f32 %v3114_v8, %v3113_v61  ;;  %v3116_v27 = vpop.f32.mrb[206].mxu1 }
 0xa0f   :  { %v3117_v30 = vpop.f32.mrb[207].mxu1 }
 0xa10   :  { %v2416_v35 = vadd.f32 %v3115_v24, %v4343_v0  ;;  %v3118_v63 = vadd.f32 %v3117_v30, %v3116_v27 }
 0xa12   :  { %2452 = vst [vmem:[%s4485_s12 + $0xf0] sm:$0xff] %v2416_v35  ;;  %v2419_v1 = vadd.f32 %v3118_v63, %v4343_v0 }
 0xa14   :  { %2453 = vst [vmem:[%s4485_s12 + $0xf8] sm:$0xff] %v2419_v1 }

</bundles_post_ra>
